<compile_context>
chip_gen: v5e
topology: v5e:2x2
jax: 0.10.0
libtpu: 0.0.40
codegen_flags: <defaults>
</compile_context>

<pallas_src>
import jax
import jax.numpy as jnp
from jax.experimental import pallas as pl
from jax.experimental.pallas import tpu as pltpu


# ----------------------------------------------------------------------------
# Tile selection: largest batch tile whose [TB, F] fp32 slab stays under budget,
# divides B, and is 8-aligned unless it equals B (BlockSpec sublane rule).
# ----------------------------------------------------------------------------
def _choose_batch_tile(B, F, bytes_per_elem=4, tile_budget_bytes=2 << 20):
    cap = max(1, tile_budget_bytes // max(1, F * bytes_per_elem))
    if B <= cap:
        return B
    valid = [d for d in range(1, B + 1) if B % d == 0 and (d % 8 == 0 or d == B)]
    fitting = [d for d in valid if d <= cap]
    return max(fitting) if fitting else min(valid)


# ----------------------------------------------------------------------------
# Fused kernel. Per batch tile:
#   out_gen  = relu(x_gen  @ W1 + b1) @ W2 + b2        (columns: [adv | cls | reg])
#   out_real = relu(x_real @ W1 + b1) @ W2 + b2
#   interp   = eps * x_real + (1 - eps) * x_gen
#   m        = relu'(interp @ W1 + b1) * w_adv          (analytic dD_adv/dh)
#   ||dD_adv/dx||^2 = m (W1^T W1) m^T = sum((m @ G) * m)     (Gram trick, no [TB,F] grad)
# Scalar partial sums are accumulated in SMEM; normalized & written on the last step.
# ----------------------------------------------------------------------------
def make_fused_loss_kernel(lambda_gp, n_cls, n_reg, total_b):
    lambda_gp = float(lambda_gp)
    inv_b = 1.0 / float(total_b)
    inv_2b = 1.0 / (2.0 * float(total_b))
    inv_breg = 1.0 / (float(total_b) * float(n_reg))
    inv_2breg = 1.0 / (2.0 * float(total_b) * float(n_reg))
    cls_sl = slice(1, 1 + n_cls)
    reg_sl = slice(1 + n_cls, 1 + n_cls + n_reg)

    def kernel(xg_ref, xr_ref, eps_ref, oh_ref, rt_ref,
               w1_ref, b1_ref, w2_ref, b2_ref, wadv_ref, gram_ref,
               out_ref, acc_ref):
        step = pl.program_id(0)

        @pl.when(step == 0)
        def _init():
            for i in range(8):
                acc_ref[i] = jnp.float32(0.0)

        xg = xg_ref[...]
        xr = xr_ref[...]
        w1 = w1_ref[...]
        b1 = b1_ref[...]
        w2 = w2_ref[...]
        b2 = b2_ref[...]

        # --- discriminator forward on gen / real tiles (x read once each) ---
        hg = jnp.maximum(jnp.dot(xg, w1, preferred_element_type=jnp.float32) + b1, 0.0)
        og = jnp.dot(hg, w2, preferred_element_type=jnp.float32) + b2
        hr = jnp.maximum(jnp.dot(xr, w1, preferred_element_type=jnp.float32) + b1, 0.0)
        orr = jnp.dot(hr, w2, preferred_element_type=jnp.float32) + b2

        # --- WGAN-GP gradient penalty via Gram identity (no [TB, F] gradient) ---
        eps = eps_ref[...]                               # [TB, 1]
        interp = eps * xr + (1.0 - eps) * xg             # [TB, F]
        hi = jnp.dot(interp, w1, preferred_element_type=jnp.float32) + b1
        m = (hi > 0.0).astype(jnp.float32) * wadv_ref[...]           # [TB, H]
        mg = jnp.dot(m, gram_ref[...], preferred_element_type=jnp.float32)
        sq = jnp.maximum(jnp.sum(mg * m, axis=-1, keepdims=True), 0.0)
        gp_tile = jnp.sum(jnp.square(jnp.sqrt(sq) - 1.0))

        # --- per-tile loss partial sums ---
        def sig(z):
            return 1.0 / (1.0 + jnp.exp(-z))

        oh = oh_ref[...]

        def ce_sum(logits):
            mx = jnp.max(logits, axis=-1, keepdims=True)
            lse = mx + jnp.log(jnp.sum(jnp.exp(logits - mx), axis=-1, keepdims=True))
            return jnp.sum(lse - jnp.sum(oh * logits, axis=-1, keepdims=True))

        rt = rt_ref[...]

        acc_ref[0] += jnp.sum(sig(og[:, 0:1]))           # sum sigmoid(gen adv)
        acc_ref[1] += jnp.sum(sig(orr[:, 0:1]))          # sum sigmoid(real adv)
        acc_ref[2] += gp_tile                            # sum (||grad|| - 1)^2
        acc_ref[3] += ce_sum(og[:, cls_sl])              # CE sum (gen)
        acc_ref[4] += ce_sum(orr[:, cls_sl])             # CE sum (real)
        acc_ref[5] += jnp.sum(jnp.square(og[:, reg_sl] - rt))   # SE sum (gen)
        acc_ref[6] += jnp.sum(jnp.square(orr[:, reg_sl] - rt))  # SE sum (real)

        # --- finalize: normalize + write the 8 scalars once ---
        @pl.when(step == pl.num_programs(0) - 1)
        def _fin():
            gen_sig_mean = acc_ref[0] * inv_b
            real_sig_mean = acc_ref[1] * inv_b
            disc_adv = gen_sig_mean - real_sig_mean
            gen_adv = -gen_sig_mean
            gp = lambda_gp * acc_ref[2] * inv_b
            disc_cls = (acc_ref[3] + acc_ref[4]) * inv_2b    # CE over cat([gen, real])
            gen_cls = acc_ref[3] * inv_b
            disc_reg = (acc_ref[5] + acc_ref[6]) * inv_2breg  # MSE over cat([gen, real])
            gen_reg = acc_ref[5] * inv_breg
            out_ref[0] = disc_adv + gen_adv
            out_ref[1] = gp
            out_ref[2] = disc_cls + gen_cls
            out_ref[3] = disc_reg + gen_reg
            out_ref[4] = disc_adv
            out_ref[5] = gen_adv
            out_ref[6] = disc_cls
            out_ref[7] = disc_reg

    return kernel


# ----------------------------------------------------------------------------
# Module wrapper
# ----------------------------------------------------------------------------
class SemiSLWGANGPLossPallas:
    def __init__(self, lambda_gp: float = 10.0, n_classes: int = 4,
                 n_reg: int = 2, hidden: int = 32):
        self.lambda_gp = float(lambda_gp)
        self.n_classes = n_classes
        self.n_reg = n_reg
        self.hidden = hidden

    def init_params(self, key, n_features):
        d_out = 1 + self.n_classes + self.n_reg
        k1, k2 = jax.random.split(key)
        return {
            "w1": 0.02 * jax.random.normal(k1, (n_features, self.hidden), jnp.float32),
            "b1": jnp.zeros((1, self.hidden), jnp.float32),
            "w2": 0.02 * jax.random.normal(k2, (self.hidden, d_out), jnp.float32),
            "b2": jnp.zeros((1, d_out), jnp.float32),
        }

    def __call__(self, params, gen_samples, real_samples, class_target, reg_target, eps):
        # assumes discriminator.training == True (else gradient_penalty would be 0)
        B = gen_samples.shape[0]
        x_gen = gen_samples.reshape(B, -1).astype(jnp.float32)
        x_real = real_samples.reshape(B, -1).astype(jnp.float32)
        F = x_gen.shape[1]

        w1, b1, w2, b2 = params["w1"], params["b1"], params["w2"], params["b2"]
        H = w1.shape[1]
        d_out = w2.shape[1]
        # analytic GP gradient is only valid for this exact 1-hidden-layer ReLU head
        assert w1.shape == (F, H) and d_out == 1 + self.n_classes + self.n_reg

        # Tiny weight preprocessing (H x H Gram + adversarial row). Keeps the big [B, F]
        # operands single-pass inside the fused kernel and avoids any F-sized W1^T copy.
        gram = jnp.dot(w1.T, w1)            # [H, H]
        wadv_row = w2[:, 0:1].T             # [1, H]

        onehot = jax.nn.one_hot(class_target, self.n_classes, dtype=jnp.float32)
        reg_tgt = reg_target.astype(jnp.float32)
        eps = eps.astype(jnp.float32).reshape(B, 1)

        tb = _choose_batch_tile(B, F)
        assert B % tb == 0
        nb = B // tb

        tiled = lambda i: (i, 0)
        const = lambda i: (0, 0)
        in_specs = [
            pl.BlockSpec((tb, F), tiled),                 # x_gen
            pl.BlockSpec((tb, F), tiled),                 # x_real
            pl.BlockSpec((tb, 1), tiled),                 # eps
            pl.BlockSpec((tb, self.n_classes), tiled),    # one-hot class target
            pl.BlockSpec((tb, self.n_reg), tiled),        # reg target
            pl.BlockSpec((F, H), const),                  # W1   (VMEM-resident)
            pl.BlockSpec((1, H), const),                  # b1
            pl.BlockSpec((H, d_out), const),              # W2
            pl.BlockSpec((1, d_out), const),              # b2
            pl.BlockSpec((1, H), const),                  # w_adv row
            pl.BlockSpec((H, H), const),                  # Gram = W1^T W1
        ]
        # TODO(synk): bf16 input transport (halves HBM traffic on v6e/v7x) is a further win
        # but changes numerics vs. the fp32 PyTorch reference, so it is not enabled here.

        vals = pl.pallas_call(
            make_fused_loss_kernel(self.lambda_gp, self.n_classes, self.n_reg, B),
            grid=(nb,),
            in_specs=in_specs,
            out_specs=pl.BlockSpec(memory_space=pltpu.MemorySpace.SMEM),
            out_shape=jax.ShapeDtypeStruct((8,), jnp.float32),
            scratch_shapes=[pltpu.SMEM((8,), jnp.float32)],
            compiler_params=pltpu.CompilerParams(
                # batch grid axis is a reduction for the scalar outputs -> "arbitrary"
                dimension_semantics=("arbitrary",),
                vmem_limit_bytes=32 * 1024 * 1024,
            ),
        )(x_gen, x_real, eps, onehot, reg_tgt, w1, b1, w2, b2, wadv_row, gram)

        return {
            "adversarial": vals[0],
            "gradient_penalty": vals[1],
            "class": vals[2],
            "reg": vals[3],
        }


# ----------------------------------------------------------------------------
# Pure-JAX reference (same semantics) for a numerical sanity check.
# ----------------------------------------------------------------------------
def reference(params, gen, real, cls_tgt, reg_tgt, eps, lambda_gp, n_cls, n_reg):
    B = gen.shape[0]
    xg = gen.reshape(B, -1).astype(jnp.float32)
    xr = real.reshape(B, -1).astype(jnp.float32)

    def D(x):
        h = jax.nn.relu(x @ params["w1"] + params["b1"])
        return h @ params["w2"] + params["b2"]

    go, ro = D(xg), D(xr)
    sig = jax.nn.sigmoid
    disc_adv = sig(go[:, 0]).mean() - sig(ro[:, 0]).mean()
    gen_adv = -sig(go[:, 0]).mean()

    interp = eps * xr + (1.0 - eps) * xg
    grad_fn = jax.grad(lambda x: jnp.sum(
        jax.nn.relu(x @ params["w1"] + params["b1"]) @ params["w2"][:, 0:1]))
    g = grad_fn(interp)
    gp = lambda_gp * jnp.mean(jnp.square(jnp.linalg.norm(g, axis=1) - 1.0))

    oh = jax.nn.one_hot(cls_tgt, n_cls, dtype=jnp.float32)

    def ce(logits):
        return jnp.mean(jax.nn.logsumexp(logits, axis=-1) - jnp.sum(oh * logits, axis=-1))

    disc_cls = 0.5 * (ce(go[:, 1:1 + n_cls]) + ce(ro[:, 1:1 + n_cls]))
    gen_cls = ce(go[:, 1:1 + n_cls])
    mse = lambda p: jnp.mean(jnp.square(p - reg_tgt))
    disc_reg = 0.5 * (mse(go[:, 1 + n_cls:]) + mse(ro[:, 1 + n_cls:]))
    gen_reg = mse(go[:, 1 + n_cls:])

    return {
        "adversarial": disc_adv + gen_adv,
        "gradient_penalty": gp,
        "class": disc_cls + gen_cls,
        "reg": disc_reg + gen_reg,
    }


if __name__ == "__main__":
    B, C, H, W = 2, 4, 16, 16
    n_classes, n_reg, hidden = 4, 2, 32

    key = jax.random.PRNGKey(0)
    k_gen, k_real, k_cls, k_reg, k_eps, k_param = jax.random.split(key, 6)

    gen_samples = jax.random.normal(k_gen, (B, C, H, W), jnp.float32)
    real_samples = jax.random.normal(k_real, (B, C, H, W), jnp.float32)
    class_target = jax.random.randint(k_cls, (B,), 0, n_classes)
    reg_target = jax.random.normal(k_reg, (B, n_reg), jnp.float32)
    eps = jax.random.uniform(k_eps, (B, 1), jnp.float32)   # torch.rand equivalent

    loss_mod = SemiSLWGANGPLossPallas(lambda_gp=10.0, n_classes=n_classes,
                                      n_reg=n_reg, hidden=hidden)
    params = loss_mod.init_params(k_param, C * H * W)

    out = loss_mod(params, gen_samples, real_samples, class_target, reg_target, eps)
    out = {k: jax.block_until_ready(v) for k, v in out.items()}

    ref = reference(params, gen_samples, real_samples, class_target, reg_target,
                    eps, 10.0, n_classes, n_reg)
    for k in out:
        assert jnp.allclose(out[k], ref[k], rtol=5e-3, atol=5e-3), (k, out[k], ref[k])

    print("KERNEL_OK")
</pallas_src>

<mosaic_0001>
module attributes {stable_mosaic.version = 11 : i64} {
  func.func @kernel(%arg0: i32, %arg1: memref<2x1024xf32, #tpu.memory_space<vmem>>, %arg2: memref<2x1024xf32, #tpu.memory_space<vmem>>, %arg3: memref<2x1xf32, #tpu.memory_space<vmem>>, %arg4: memref<2x4xf32, #tpu.memory_space<vmem>>, %arg5: memref<2x2xf32, #tpu.memory_space<vmem>>, %arg6: memref<1024x32xf32, #tpu.memory_space<vmem>>, %arg7: memref<1x32xf32, #tpu.memory_space<vmem>>, %arg8: memref<32x7xf32, #tpu.memory_space<vmem>>, %arg9: memref<1x7xf32, #tpu.memory_space<vmem>>, %arg10: memref<1x32xf32, #tpu.memory_space<vmem>>, %arg11: memref<32x32xf32, #tpu.memory_space<vmem>>, %arg12: memref<8xf32, #tpu.memory_space<smem>>, %arg13: memref<8xf32, #tpu.memory_space<smem>>) attributes {dimension_semantics = [#tpu.dimension_semantics<arbitrary>], iteration_bounds = array<i64: 1>, scalar_prefetch = 0 : i64, scratch_operands = 1 : i64, tpu.core_type = #tpu.core_type<tc>, window_params = [{transform_indices = @transform_0, window_bounds = array<i64: 2, 1024>}, {transform_indices = @transform_1, window_bounds = array<i64: 2, 1024>}, {transform_indices = @transform_2, window_bounds = array<i64: 2, 1>}, {transform_indices = @transform_3, window_bounds = array<i64: 2, 4>}, {transform_indices = @transform_4, window_bounds = array<i64: 2, 2>}, {pipeline_mode = #tpu.pipeline_mode<synchronous>, transform_indices = @transform_5, window_bounds = array<i64: 1024, 32>}, {pipeline_mode = #tpu.pipeline_mode<synchronous>, transform_indices = @transform_6, window_bounds = array<i64: 1, 32>}, {pipeline_mode = #tpu.pipeline_mode<synchronous>, transform_indices = @transform_7, window_bounds = array<i64: 32, 7>}, {pipeline_mode = #tpu.pipeline_mode<synchronous>, transform_indices = @transform_8, window_bounds = array<i64: 1, 7>}, {pipeline_mode = #tpu.pipeline_mode<synchronous>, transform_indices = @transform_9, window_bounds = array<i64: 1, 32>}, {pipeline_mode = #tpu.pipeline_mode<synchronous>, transform_indices = @transform_10, window_bounds = array<i64: 32, 32>}, {transform_indices = @transform_11, window_bounds = array<i64: 8>}]} {
    %c0_i32 = arith.constant 0 : i32
    %0 = arith.cmpi eq, %arg0, %c0_i32 : i32
    %1 = arith.extui %0 : i1 to i32
    %c0_i32_0 = arith.constant 0 : i32
    %2 = arith.cmpi ne, %1, %c0_i32_0 : i32
    scf.if %2 {
      %cst_63 = arith.constant 0.000000e+00 : f32
      %c0_64 = arith.constant 0 : index
      %158 = memref.load %arg13[%c0_64] : memref<8xf32, #tpu.memory_space<smem>>
      memref.store %cst_63, %arg13[%c0_64] : memref<8xf32, #tpu.memory_space<smem>>
      %cst_65 = arith.constant 0.000000e+00 : f32
      %c1_66 = arith.constant 1 : index
      %159 = memref.load %arg13[%c1_66] : memref<8xf32, #tpu.memory_space<smem>>
      memref.store %cst_65, %arg13[%c1_66] : memref<8xf32, #tpu.memory_space<smem>>
      %cst_67 = arith.constant 0.000000e+00 : f32
      %c2_68 = arith.constant 2 : index
      %160 = memref.load %arg13[%c2_68] : memref<8xf32, #tpu.memory_space<smem>>
      memref.store %cst_67, %arg13[%c2_68] : memref<8xf32, #tpu.memory_space<smem>>
      %cst_69 = arith.constant 0.000000e+00 : f32
      %c3_70 = arith.constant 3 : index
      %161 = memref.load %arg13[%c3_70] : memref<8xf32, #tpu.memory_space<smem>>
      memref.store %cst_69, %arg13[%c3_70] : memref<8xf32, #tpu.memory_space<smem>>
      %cst_71 = arith.constant 0.000000e+00 : f32
      %c4_72 = arith.constant 4 : index
      %162 = memref.load %arg13[%c4_72] : memref<8xf32, #tpu.memory_space<smem>>
      memref.store %cst_71, %arg13[%c4_72] : memref<8xf32, #tpu.memory_space<smem>>
      %cst_73 = arith.constant 0.000000e+00 : f32
      %c5_74 = arith.constant 5 : index
      %163 = memref.load %arg13[%c5_74] : memref<8xf32, #tpu.memory_space<smem>>
      memref.store %cst_73, %arg13[%c5_74] : memref<8xf32, #tpu.memory_space<smem>>
      %cst_75 = arith.constant 0.000000e+00 : f32
      %c6_76 = arith.constant 6 : index
      %164 = memref.load %arg13[%c6_76] : memref<8xf32, #tpu.memory_space<smem>>
      memref.store %cst_75, %arg13[%c6_76] : memref<8xf32, #tpu.memory_space<smem>>
      %cst_77 = arith.constant 0.000000e+00 : f32
      %c7 = arith.constant 7 : index
      %165 = memref.load %arg13[%c7] : memref<8xf32, #tpu.memory_space<smem>>
      memref.store %cst_77, %arg13[%c7] : memref<8xf32, #tpu.memory_space<smem>>
    } else {
    }
    %c0 = arith.constant 0 : index
    %c0_1 = arith.constant 0 : index
    %3 = vector.load %arg1[%c0, %c0_1] : memref<2x1024xf32, #tpu.memory_space<vmem>>, vector<2x1024xf32>
    %c0_2 = arith.constant 0 : index
    %c0_3 = arith.constant 0 : index
    %4 = vector.load %arg2[%c0_2, %c0_3] : memref<2x1024xf32, #tpu.memory_space<vmem>>, vector<2x1024xf32>
    %c0_4 = arith.constant 0 : index
    %c0_5 = arith.constant 0 : index
    %5 = vector.load %arg6[%c0_4, %c0_5] : memref<1024x32xf32, #tpu.memory_space<vmem>>, vector<1024x32xf32>
    %c0_6 = arith.constant 0 : index
    %c0_7 = arith.constant 0 : index
    %6 = vector.load %arg7[%c0_6, %c0_7] : memref<1x32xf32, #tpu.memory_space<vmem>>, vector<1x32xf32>
    %c0_8 = arith.constant 0 : index
    %c0_9 = arith.constant 0 : index
    %7 = vector.load %arg8[%c0_8, %c0_9] : memref<32x7xf32, #tpu.memory_space<vmem>>, vector<32x7xf32>
    %c0_10 = arith.constant 0 : index
    %c0_11 = arith.constant 0 : index
    %8 = vector.load %arg9[%c0_10, %c0_11] : memref<1x7xf32, #tpu.memory_space<vmem>>, vector<1x7xf32>
    %cst = arith.constant dense<0.000000e+00> : vector<2x32xf32>
    %9 = tpu.matmul %3, %5, %cst {dimension_numbers = #tpu.dot_dimension_numbers<[1], [0], [0], [1], [0, 0, 1, 1], [], []>} : vector<2x1024xf32>, vector<1024x32xf32>, vector<2x32xf32> -> vector<2x32xf32>
    %10 = vector.broadcast %6 : vector<1x32xf32> to vector<2x32xf32>
    %11 = arith.addf %9, %10 : vector<2x32xf32>
    %cst_12 = arith.constant 0.000000e+00 : f32
    %12 = vector.broadcast %cst_12 : f32 to vector<2x32xf32>
    %13 = arith.maximumf %11, %12 : vector<2x32xf32>
    %cst_13 = arith.constant dense<0.000000e+00> : vector<2x7xf32>
    %14 = tpu.matmul %13, %7, %cst_13 {dimension_numbers = #tpu.dot_dimension_numbers<[1], [0], [0], [1], [0, 0, 1, 1], [], []>} : vector<2x32xf32>, vector<32x7xf32>, vector<2x7xf32> -> vector<2x7xf32>
    %15 = vector.broadcast %8 : vector<1x7xf32> to vector<2x7xf32>
    %16 = arith.addf %14, %15 : vector<2x7xf32>
    %cst_14 = arith.constant dense<0.000000e+00> : vector<2x32xf32>
    %17 = tpu.matmul %4, %5, %cst_14 {dimension_numbers = #tpu.dot_dimension_numbers<[1], [0], [0], [1], [0, 0, 1, 1], [], []>} : vector<2x1024xf32>, vector<1024x32xf32>, vector<2x32xf32> -> vector<2x32xf32>
    %18 = vector.broadcast %6 : vector<1x32xf32> to vector<2x32xf32>
    %19 = arith.addf %17, %18 : vector<2x32xf32>
    %cst_15 = arith.constant 0.000000e+00 : f32
    %20 = vector.broadcast %cst_15 : f32 to vector<2x32xf32>
    %21 = arith.maximumf %19, %20 : vector<2x32xf32>
    %cst_16 = arith.constant dense<0.000000e+00> : vector<2x7xf32>
    %22 = tpu.matmul %21, %7, %cst_16 {dimension_numbers = #tpu.dot_dimension_numbers<[1], [0], [0], [1], [0, 0, 1, 1], [], []>} : vector<2x32xf32>, vector<32x7xf32>, vector<2x7xf32> -> vector<2x7xf32>
    %23 = vector.broadcast %8 : vector<1x7xf32> to vector<2x7xf32>
    %24 = arith.addf %22, %23 : vector<2x7xf32>
    %c0_17 = arith.constant 0 : index
    %c0_18 = arith.constant 0 : index
    %25 = vector.load %arg3[%c0_17, %c0_18] : memref<2x1xf32, #tpu.memory_space<vmem>>, vector<2x1xf32>
    %26 = vector.broadcast %25 : vector<2x1xf32> to vector<2x1024xf32>
    %27 = arith.mulf %26, %4 : vector<2x1024xf32>
    %cst_19 = arith.constant 1.000000e+00 : f32
    %28 = vector.broadcast %cst_19 : f32 to vector<2x1xf32>
    %29 = arith.subf %28, %25 : vector<2x1xf32>
    %30 = vector.broadcast %29 : vector<2x1xf32> to vector<2x1024xf32>
    %31 = arith.mulf %30, %3 : vector<2x1024xf32>
    %32 = arith.addf %27, %31 : vector<2x1024xf32>
    %cst_20 = arith.constant dense<0.000000e+00> : vector<2x32xf32>
    %33 = tpu.matmul %32, %5, %cst_20 {dimension_numbers = #tpu.dot_dimension_numbers<[1], [0], [0], [1], [0, 0, 1, 1], [], []>} : vector<2x1024xf32>, vector<1024x32xf32>, vector<2x32xf32> -> vector<2x32xf32>
    %34 = vector.broadcast %6 : vector<1x32xf32> to vector<2x32xf32>
    %35 = arith.addf %33, %34 : vector<2x32xf32>
    %cst_21 = arith.constant 0.000000e+00 : f32
    %36 = vector.broadcast %cst_21 : f32 to vector<2x32xf32>
    %37 = arith.cmpf ogt, %35, %36 : vector<2x32xf32>
    %38 = arith.extui %37 : vector<2x32xi1> to vector<2x32xi32>
    %39 = arith.sitofp %38 : vector<2x32xi32> to vector<2x32xf32>
    %c0_22 = arith.constant 0 : index
    %c0_23 = arith.constant 0 : index
    %40 = vector.load %arg10[%c0_22, %c0_23] : memref<1x32xf32, #tpu.memory_space<vmem>>, vector<1x32xf32>
    %41 = vector.broadcast %40 : vector<1x32xf32> to vector<2x32xf32>
    %42 = arith.mulf %39, %41 : vector<2x32xf32>
    %c0_24 = arith.constant 0 : index
    %c0_25 = arith.constant 0 : index
    %43 = vector.load %arg11[%c0_24, %c0_25] : memref<32x32xf32, #tpu.memory_space<vmem>>, vector<32x32xf32>
    %cst_26 = arith.constant dense<0.000000e+00> : vector<2x32xf32>
    %44 = tpu.matmul %42, %43, %cst_26 {dimension_numbers = #tpu.dot_dimension_numbers<[1], [0], [0], [1], [0, 0, 1, 1], [], []>} : vector<2x32xf32>, vector<32x32xf32>, vector<2x32xf32> -> vector<2x32xf32>
    %45 = arith.mulf %44, %42 : vector<2x32xf32>
    %cst_27 = arith.constant dense<0.000000e+00> : vector<2xf32>
    %46 = vector.multi_reduction <add>, %45, %cst_27 [1] : vector<2x32xf32> to vector<2xf32>
    %47 = vector.shape_cast %46 : vector<2xf32> to vector<2x1xf32>
    %cst_28 = arith.constant 0.000000e+00 : f32
    %48 = vector.broadcast %cst_28 : f32 to vector<2x1xf32>
    %49 = arith.maximumf %47, %48 : vector<2x1xf32>
    %50 = math.sqrt %49 : vector<2x1xf32>
    %cst_29 = arith.constant 1.000000e+00 : f32
    %51 = vector.broadcast %cst_29 : f32 to vector<2x1xf32>
    %52 = arith.subf %50, %51 : vector<2x1xf32>
    %53 = arith.mulf %52, %52 : vector<2x1xf32>
    %54 = vector.shape_cast %53 : vector<2x1xf32> to vector<1x2x1xf32>
    %cst_30 = arith.constant dense<0.000000e+00> : vector<1xf32>
    %55 = vector.multi_reduction <add>, %54, %cst_30 [1, 2] : vector<1x2x1xf32> to vector<1xf32>
    %56 = vector.shape_cast %55 : vector<1xf32> to vector<1x1x1xf32>
    %57 = vector.extract %56[0, 0, 0] : f32 from vector<1x1x1xf32>
    %c0_31 = arith.constant 0 : index
    %c0_32 = arith.constant 0 : index
    %58 = vector.load %arg4[%c0_31, %c0_32] : memref<2x4xf32, #tpu.memory_space<vmem>>, vector<2x4xf32>
    %c0_33 = arith.constant 0 : index
    %c0_34 = arith.constant 0 : index
    %59 = vector.load %arg5[%c0_33, %c0_34] : memref<2x2xf32, #tpu.memory_space<vmem>>, vector<2x2xf32>
    %c0_35 = arith.constant 0 : index
    %60 = memref.load %arg13[%c0_35] : memref<8xf32, #tpu.memory_space<smem>>
    %61 = vector.extract_strided_slice %16 {offsets = [0, 0], sizes = [2, 1], strides = [1, 1]} : vector<2x7xf32> to vector<2x1xf32>
    %cst_36 = arith.constant 0.000000e+00 : f32
    %62 = vector.broadcast %cst_36 : f32 to vector<2x1xf32>
    %63 = arith.subf %62, %61 : vector<2x1xf32>
    %64 = math.exp %63 : vector<2x1xf32>
    %cst_37 = arith.constant 1.000000e+00 : f32
    %65 = vector.broadcast %cst_37 : f32 to vector<2x1xf32>
    %66 = arith.addf %65, %64 : vector<2x1xf32>
    %cst_38 = arith.constant 1.000000e+00 : f32
    %67 = vector.broadcast %cst_38 : f32 to vector<2x1xf32>
    %68 = arith.divf %67, %66 : vector<2x1xf32>
    %69 = vector.shape_cast %68 : vector<2x1xf32> to vector<1x2x1xf32>
    %cst_39 = arith.constant dense<0.000000e+00> : vector<1xf32>
    %70 = vector.multi_reduction <add>, %69, %cst_39 [1, 2] : vector<1x2x1xf32> to vector<1xf32>
    %71 = vector.shape_cast %70 : vector<1xf32> to vector<1x1x1xf32>
    %72 = vector.extract %71[0, 0, 0] : f32 from vector<1x1x1xf32>
    %73 = arith.addf %60, %72 : f32
    %c0_40 = arith.constant 0 : index
    %74 = memref.load %arg13[%c0_40] : memref<8xf32, #tpu.memory_space<smem>>
    memref.store %73, %arg13[%c0_40] : memref<8xf32, #tpu.memory_space<smem>>
    %c1 = arith.constant 1 : index
    %75 = memref.load %arg13[%c1] : memref<8xf32, #tpu.memory_space<smem>>
    %76 = vector.extract_strided_slice %24 {offsets = [0, 0], sizes = [2, 1], strides = [1, 1]} : vector<2x7xf32> to vector<2x1xf32>
    %cst_41 = arith.constant 0.000000e+00 : f32
    %77 = vector.broadcast %cst_41 : f32 to vector<2x1xf32>
    %78 = arith.subf %77, %76 : vector<2x1xf32>
    %79 = math.exp %78 : vector<2x1xf32>
    %cst_42 = arith.constant 1.000000e+00 : f32
    %80 = vector.broadcast %cst_42 : f32 to vector<2x1xf32>
    %81 = arith.addf %80, %79 : vector<2x1xf32>
    %cst_43 = arith.constant 1.000000e+00 : f32
    %82 = vector.broadcast %cst_43 : f32 to vector<2x1xf32>
    %83 = arith.divf %82, %81 : vector<2x1xf32>
    %84 = vector.shape_cast %83 : vector<2x1xf32> to vector<1x2x1xf32>
    %cst_44 = arith.constant dense<0.000000e+00> : vector<1xf32>
    %85 = vector.multi_reduction <add>, %84, %cst_44 [1, 2] : vector<1x2x1xf32> to vector<1xf32>
    %86 = vector.shape_cast %85 : vector<1xf32> to vector<1x1x1xf32>
    %87 = vector.extract %86[0, 0, 0] : f32 from vector<1x1x1xf32>
    %88 = arith.addf %75, %87 : f32
    %c1_45 = arith.constant 1 : index
    %89 = memref.load %arg13[%c1_45] : memref<8xf32, #tpu.memory_space<smem>>
    memref.store %88, %arg13[%c1_45] : memref<8xf32, #tpu.memory_space<smem>>
    %c2 = arith.constant 2 : index
    %90 = memref.load %arg13[%c2] : memref<8xf32, #tpu.memory_space<smem>>
    %91 = arith.addf %90, %57 : f32
    %c2_46 = arith.constant 2 : index
    %92 = memref.load %arg13[%c2_46] : memref<8xf32, #tpu.memory_space<smem>>
    memref.store %91, %arg13[%c2_46] : memref<8xf32, #tpu.memory_space<smem>>
    %c3 = arith.constant 3 : index
    %93 = memref.load %arg13[%c3] : memref<8xf32, #tpu.memory_space<smem>>
    %94 = vector.extract_strided_slice %16 {offsets = [0, 1], sizes = [2, 4], strides = [1, 1]} : vector<2x7xf32> to vector<2x4xf32>
    %cst_47 = arith.constant dense<0xFF800000> : vector<2xf32>
    %95 = vector.multi_reduction <maximumf>, %94, %cst_47 [1] : vector<2x4xf32> to vector<2xf32>
    %96 = vector.shape_cast %95 : vector<2xf32> to vector<2x1xf32>
    %97 = vector.broadcast %96 : vector<2x1xf32> to vector<2x4xf32>
    %98 = arith.subf %94, %97 : vector<2x4xf32>
    %99 = math.exp %98 : vector<2x4xf32>
    %cst_48 = arith.constant dense<0.000000e+00> : vector<2xf32>
    %100 = vector.multi_reduction <add>, %99, %cst_48 [1] : vector<2x4xf32> to vector<2xf32>
    %101 = vector.shape_cast %100 : vector<2xf32> to vector<2x1xf32>
    %102 = math.log %101 : vector<2x1xf32>
    %103 = arith.addf %96, %102 : vector<2x1xf32>
    %104 = arith.mulf %58, %94 : vector<2x4xf32>
    %cst_49 = arith.constant dense<0.000000e+00> : vector<2xf32>
    %105 = vector.multi_reduction <add>, %104, %cst_49 [1] : vector<2x4xf32> to vector<2xf32>
    %106 = vector.shape_cast %105 : vector<2xf32> to vector<2x1xf32>
    %107 = arith.subf %103, %106 : vector<2x1xf32>
    %108 = vector.shape_cast %107 : vector<2x1xf32> to vector<1x2x1xf32>
    %cst_50 = arith.constant dense<0.000000e+00> : vector<1xf32>
    %109 = vector.multi_reduction <add>, %108, %cst_50 [1, 2] : vector<1x2x1xf32> to vector<1xf32>
    %110 = vector.shape_cast %109 : vector<1xf32> to vector<1x1x1xf32>
    %111 = vector.extract %110[0, 0, 0] : f32 from vector<1x1x1xf32>
    %112 = arith.addf %93, %111 : f32
    %c3_51 = arith.constant 3 : index
    %113 = memref.load %arg13[%c3_51] : memref<8xf32, #tpu.memory_space<smem>>
    memref.store %112, %arg13[%c3_51] : memref<8xf32, #tpu.memory_space<smem>>
    %c4 = arith.constant 4 : index
    %114 = memref.load %arg13[%c4] : memref<8xf32, #tpu.memory_space<smem>>
    %115 = vector.extract_strided_slice %24 {offsets = [0, 1], sizes = [2, 4], strides = [1, 1]} : vector<2x7xf32> to vector<2x4xf32>
    %cst_52 = arith.constant dense<0xFF800000> : vector<2xf32>
    %116 = vector.multi_reduction <maximumf>, %115, %cst_52 [1] : vector<2x4xf32> to vector<2xf32>
    %117 = vector.shape_cast %116 : vector<2xf32> to vector<2x1xf32>
    %118 = vector.broadcast %117 : vector<2x1xf32> to vector<2x4xf32>
    %119 = arith.subf %115, %118 : vector<2x4xf32>
    %120 = math.exp %119 : vector<2x4xf32>
    %cst_53 = arith.constant dense<0.000000e+00> : vector<2xf32>
    %121 = vector.multi_reduction <add>, %120, %cst_53 [1] : vector<2x4xf32> to vector<2xf32>
    %122 = vector.shape_cast %121 : vector<2xf32> to vector<2x1xf32>
    %123 = math.log %122 : vector<2x1xf32>
    %124 = arith.addf %117, %123 : vector<2x1xf32>
    %125 = arith.mulf %58, %115 : vector<2x4xf32>
    %cst_54 = arith.constant dense<0.000000e+00> : vector<2xf32>
    %126 = vector.multi_reduction <add>, %125, %cst_54 [1] : vector<2x4xf32> to vector<2xf32>
    %127 = vector.shape_cast %126 : vector<2xf32> to vector<2x1xf32>
    %128 = arith.subf %124, %127 : vector<2x1xf32>
    %129 = vector.shape_cast %128 : vector<2x1xf32> to vector<1x2x1xf32>
    %cst_55 = arith.constant dense<0.000000e+00> : vector<1xf32>
    %130 = vector.multi_reduction <add>, %129, %cst_55 [1, 2] : vector<1x2x1xf32> to vector<1xf32>
    %131 = vector.shape_cast %130 : vector<1xf32> to vector<1x1x1xf32>
    %132 = vector.extract %131[0, 0, 0] : f32 from vector<1x1x1xf32>
    %133 = arith.addf %114, %132 : f32
    %c4_56 = arith.constant 4 : index
    %134 = memref.load %arg13[%c4_56] : memref<8xf32, #tpu.memory_space<smem>>
    memref.store %133, %arg13[%c4_56] : memref<8xf32, #tpu.memory_space<smem>>
    %c5 = arith.constant 5 : index
    %135 = memref.load %arg13[%c5] : memref<8xf32, #tpu.memory_space<smem>>
    %136 = vector.extract_strided_slice %16 {offsets = [0, 5], sizes = [2, 2], strides = [1, 1]} : vector<2x7xf32> to vector<2x2xf32>
    %137 = arith.subf %136, %59 : vector<2x2xf32>
    %138 = arith.mulf %137, %137 : vector<2x2xf32>
    %139 = vector.shape_cast %138 : vector<2x2xf32> to vector<1x2x2xf32>
    %cst_57 = arith.constant dense<0.000000e+00> : vector<1xf32>
    %140 = vector.multi_reduction <add>, %139, %cst_57 [1, 2] : vector<1x2x2xf32> to vector<1xf32>
    %141 = vector.shape_cast %140 : vector<1xf32> to vector<1x1x1xf32>
    %142 = vector.extract %141[0, 0, 0] : f32 from vector<1x1x1xf32>
    %143 = arith.addf %135, %142 : f32
    %c5_58 = arith.constant 5 : index
    %144 = memref.load %arg13[%c5_58] : memref<8xf32, #tpu.memory_space<smem>>
    memref.store %143, %arg13[%c5_58] : memref<8xf32, #tpu.memory_space<smem>>
    %c6 = arith.constant 6 : index
    %145 = memref.load %arg13[%c6] : memref<8xf32, #tpu.memory_space<smem>>
    %146 = vector.extract_strided_slice %24 {offsets = [0, 5], sizes = [2, 2], strides = [1, 1]} : vector<2x7xf32> to vector<2x2xf32>
    %147 = arith.subf %146, %59 : vector<2x2xf32>
    %148 = arith.mulf %147, %147 : vector<2x2xf32>
    %149 = vector.shape_cast %148 : vector<2x2xf32> to vector<1x2x2xf32>
    %cst_59 = arith.constant dense<0.000000e+00> : vector<1xf32>
    %150 = vector.multi_reduction <add>, %149, %cst_59 [1, 2] : vector<1x2x2xf32> to vector<1xf32>
    %151 = vector.shape_cast %150 : vector<1xf32> to vector<1x1x1xf32>
    %152 = vector.extract %151[0, 0, 0] : f32 from vector<1x1x1xf32>
    %153 = arith.addf %145, %152 : f32
    %c6_60 = arith.constant 6 : index
    %154 = memref.load %arg13[%c6_60] : memref<8xf32, #tpu.memory_space<smem>>
    memref.store %153, %arg13[%c6_60] : memref<8xf32, #tpu.memory_space<smem>>
    %c0_i32_61 = arith.constant 0 : i32
    %155 = arith.cmpi eq, %arg0, %c0_i32_61 : i32
    %156 = arith.extui %155 : i1 to i32
    %c0_i32_62 = arith.constant 0 : i32
    %157 = arith.cmpi ne, %156, %c0_i32_62 : i32
    scf.if %157 {
      %c0_63 = arith.constant 0 : index
      %158 = memref.load %arg13[%c0_63] : memref<8xf32, #tpu.memory_space<smem>>
      %cst_64 = arith.constant 5.000000e-01 : f32
      %159 = arith.mulf %158, %cst_64 : f32
      %c1_65 = arith.constant 1 : index
      %160 = memref.load %arg13[%c1_65] : memref<8xf32, #tpu.memory_space<smem>>
      %cst_66 = arith.constant 5.000000e-01 : f32
      %161 = arith.mulf %160, %cst_66 : f32
      %162 = arith.subf %159, %161 : f32
      %cst_67 = arith.constant 0.000000e+00 : f32
      %163 = arith.subf %cst_67, %159 : f32
      %c2_68 = arith.constant 2 : index
      %164 = memref.load %arg13[%c2_68] : memref<8xf32, #tpu.memory_space<smem>>
      %cst_69 = arith.constant 1.000000e+01 : f32
      %165 = arith.mulf %cst_69, %164 : f32
      %cst_70 = arith.constant 5.000000e-01 : f32
      %166 = arith.mulf %165, %cst_70 : f32
      %c3_71 = arith.constant 3 : index
      %167 = memref.load %arg13[%c3_71] : memref<8xf32, #tpu.memory_space<smem>>
      %c4_72 = arith.constant 4 : index
      %168 = memref.load %arg13[%c4_72] : memref<8xf32, #tpu.memory_space<smem>>
      %169 = arith.addf %167, %168 : f32
      %cst_73 = arith.constant 2.500000e-01 : f32
      %170 = arith.mulf %169, %cst_73 : f32
      %c3_74 = arith.constant 3 : index
      %171 = memref.load %arg13[%c3_74] : memref<8xf32, #tpu.memory_space<smem>>
      %cst_75 = arith.constant 5.000000e-01 : f32
      %172 = arith.mulf %171, %cst_75 : f32
      %c5_76 = arith.constant 5 : index
      %173 = memref.load %arg13[%c5_76] : memref<8xf32, #tpu.memory_space<smem>>
      %c6_77 = arith.constant 6 : index
      %174 = memref.load %arg13[%c6_77] : memref<8xf32, #tpu.memory_space<smem>>
      %175 = arith.addf %173, %174 : f32
      %cst_78 = arith.constant 1.250000e-01 : f32
      %176 = arith.mulf %175, %cst_78 : f32
      %c5_79 = arith.constant 5 : index
      %177 = memref.load %arg13[%c5_79] : memref<8xf32, #tpu.memory_space<smem>>
      %cst_80 = arith.constant 2.500000e-01 : f32
      %178 = arith.mulf %177, %cst_80 : f32
      %179 = arith.addf %162, %163 : f32
      %c0_81 = arith.constant 0 : index
      %180 = memref.load %arg12[%c0_81] : memref<8xf32, #tpu.memory_space<smem>>
      memref.store %179, %arg12[%c0_81] : memref<8xf32, #tpu.memory_space<smem>>
      %c1_82 = arith.constant 1 : index
      %181 = memref.load %arg12[%c1_82] : memref<8xf32, #tpu.memory_space<smem>>
      memref.store %166, %arg12[%c1_82] : memref<8xf32, #tpu.memory_space<smem>>
      %182 = arith.addf %170, %172 : f32
      %c2_83 = arith.constant 2 : index
      %183 = memref.load %arg12[%c2_83] : memref<8xf32, #tpu.memory_space<smem>>
      memref.store %182, %arg12[%c2_83] : memref<8xf32, #tpu.memory_space<smem>>
      %184 = arith.addf %176, %178 : f32
      %c3_84 = arith.constant 3 : index
      %185 = memref.load %arg12[%c3_84] : memref<8xf32, #tpu.memory_space<smem>>
      memref.store %184, %arg12[%c3_84] : memref<8xf32, #tpu.memory_space<smem>>
      %c4_85 = arith.constant 4 : index
      %186 = memref.load %arg12[%c4_85] : memref<8xf32, #tpu.memory_space<smem>>
      memref.store %162, %arg12[%c4_85] : memref<8xf32, #tpu.memory_space<smem>>
      %c5_86 = arith.constant 5 : index
      %187 = memref.load %arg12[%c5_86] : memref<8xf32, #tpu.memory_space<smem>>
      memref.store %163, %arg12[%c5_86] : memref<8xf32, #tpu.memory_space<smem>>
      %c6_87 = arith.constant 6 : index
      %188 = memref.load %arg12[%c6_87] : memref<8xf32, #tpu.memory_space<smem>>
      memref.store %170, %arg12[%c6_87] : memref<8xf32, #tpu.memory_space<smem>>
      %c7 = arith.constant 7 : index
      %189 = memref.load %arg12[%c7] : memref<8xf32, #tpu.memory_space<smem>>
      memref.store %176, %arg12[%c7] : memref<8xf32, #tpu.memory_space<smem>>
    } else {
    }
    return
  }
  func.func @transform_0(%arg0: i32) -> (i32, i32) {
    %c0_i32 = arith.constant 0 : i32
    %c0_i32_0 = arith.constant 0 : i32
    return %arg0, %c0_i32 : i32, i32
  }
  func.func @transform_1(%arg0: i32) -> (i32, i32) {
    %c0_i32 = arith.constant 0 : i32
    %c0_i32_0 = arith.constant 0 : i32
    return %arg0, %c0_i32 : i32, i32
  }
  func.func @transform_2(%arg0: i32) -> (i32, i32) {
    %c0_i32 = arith.constant 0 : i32
    %c0_i32_0 = arith.constant 0 : i32
    return %arg0, %c0_i32 : i32, i32
  }
  func.func @transform_3(%arg0: i32) -> (i32, i32) {
    %c0_i32 = arith.constant 0 : i32
    %c0_i32_0 = arith.constant 0 : i32
    return %arg0, %c0_i32 : i32, i32
  }
  func.func @transform_4(%arg0: i32) -> (i32, i32) {
    %c0_i32 = arith.constant 0 : i32
    %c0_i32_0 = arith.constant 0 : i32
    return %arg0, %c0_i32 : i32, i32
  }
  func.func @transform_5(%arg0: i32) -> (i32, i32) {
    %c0_i32 = arith.constant 0 : i32
    %c0_i32_0 = arith.constant 0 : i32
    %c0_i32_1 = arith.constant 0 : i32
    return %c0_i32, %c0_i32_0 : i32, i32
  }
  func.func @transform_6(%arg0: i32) -> (i32, i32) {
    %c0_i32 = arith.constant 0 : i32
    %c0_i32_0 = arith.constant 0 : i32
    %c0_i32_1 = arith.constant 0 : i32
    return %c0_i32, %c0_i32_0 : i32, i32
  }
  func.func @transform_7(%arg0: i32) -> (i32, i32) {
    %c0_i32 = arith.constant 0 : i32
    %c0_i32_0 = arith.constant 0 : i32
    %c0_i32_1 = arith.constant 0 : i32
    return %c0_i32, %c0_i32_0 : i32, i32
  }
  func.func @transform_8(%arg0: i32) -> (i32, i32) {
    %c0_i32 = arith.constant 0 : i32
    %c0_i32_0 = arith.constant 0 : i32
    %c0_i32_1 = arith.constant 0 : i32
    return %c0_i32, %c0_i32_0 : i32, i32
  }
  func.func @transform_9(%arg0: i32) -> (i32, i32) {
    %c0_i32 = arith.constant 0 : i32
    %c0_i32_0 = arith.constant 0 : i32
    %c0_i32_1 = arith.constant 0 : i32
    return %c0_i32, %c0_i32_0 : i32, i32
  }
  func.func @transform_10(%arg0: i32) -> (i32, i32) {
    %c0_i32 = arith.constant 0 : i32
    %c0_i32_0 = arith.constant 0 : i32
    %c0_i32_1 = arith.constant 0 : i32
    return %c0_i32, %c0_i32_0 : i32, i32
  }
  func.func @transform_11(%arg0: i32) -> i32 {
    %c0_i32 = arith.constant 0 : i32
    %c0_i32_0 = arith.constant 0 : i32
    return %c0_i32 : i32
  }
}

</mosaic_0001>

<bundles_post_ra>
// kernel: tpu_custom_call.1
= control target key start
LH: loop header
LB: loop body
LE: loop exit
PB: predicated region body
PF: predicated region fallthrough
CT: control target
= control target key end

     0   :  { %s2520_s0 = inlined_call_operand.vmem [shape: f32[2,1024], index: 0, kind: input, shape index: {}]   ;;  %s2521_s1 = inlined_call_operand.vmem [shape: f32[2,1024], index: 1, kind: input, shape index: {}]   ;;  %s2522_s2 = inlined_call_operand.vmem [shape: f32[2,1], index: 2, kind: input, shape index: {}]   ;;  %s2523_s3 = inlined_call_operand.vmem [shape: f32[2,4], index: 3, kind: input, shape index: {}]   ;;  %s2524_s4 = inlined_call_operand.vmem [shape: f32[2,2], index: 4, kind: input, shape index: {}]   ;;  %s2525_s5 = inlined_call_operand.vmem [shape: f32[1024,32], index: 5, kind: input, shape index: {}]   ;;  %s2526_s6 = inlined_call_operand.vmem [shape: f32[1,32], index: 6, kind: input, shape index: {}]   ;;  %s2527_s7 = inlined_call_operand.vmem [shape: f32[32,7], index: 7, kind: input, shape index: {}]   ;;  %s2528_s8 = inlined_call_operand.vmem [shape: f32[1,7], index: 8, kind: input, shape index: {}]   ;;  %s2529_s9 = inlined_call_operand.vmem [shape: f32[1,32], index: 9, kind: input, shape index: {}]   ;;  %s2530_s10 = inlined_call_operand.vmem [shape: f32[32,32], index: 10, kind: input, shape index: {}]   ;;  %s2531_s11 = inlined_call_operand.hbm [shape: f32[8], index: 11, kind: output, shape index: {}]  }
   0x1   :  { %v1316_v0 = vld [vmem:[%s2525_s5 + $0x178] sm:$0xff]  ;;  %v1326_v2 = vld [vmem:[%s2525_s5 + $0x170] sm:$0xff]  ;;  %v1350_v6 = vld [vmem:[%s2525_s5 + $0x168] sm:$0xff] }
   0x2   :  { %v1321_v1 = vld [vmem:[%s2525_s5 + $0x78] sm:$0xff]  ;;  %261 = vmatpush.msra.mxu2 %v1316_v0  ;;  %v1338_v4 = vld [vmem:[%s2525_s5 + $0x70] sm:$0xff]  ;;  %v1360_v8 = vld [vmem:[%s2525_s5 + $0x68] sm:$0xff] }
   0x3   :  { %221 = vmatpush.msra.mxu0 %v1321_v1  ;;  %v1333_v3 = vld [vmem:[%s2525_s5 + $0x1f8] sm:$0xff]  ;;  %v1355_v7 = vld [vmem:[%s2525_s5 + $0x1f0] sm:$0xff]  ;;  %v1372_v10 = vld [vmem:[%s2525_s5 + $0x1e8] sm:$0xff] }
   0x4   :  { %v1343_v5 = vld [vmem:[%s2525_s5 + $0xf8] sm:$0xff]  ;;  %281 = vmatpush.msra.mxu3 %v1333_v3  ;;  %262 = vmatpush.msra.mxu2 %v1326_v2  ;;  %v1367_v9 = vld [vmem:[%s2525_s5 + $0xf0] sm:$0xff]  ;;  %v1379_v11 = vld [vmem:[%s2525_s5 + $0x160] sm:$0xff] }
   0x5   :  { %241 = vmatpush.msra.mxu1 %v1343_v5  ;;  %222 = vmatpush.msra.mxu0 %v1338_v4  ;;  %v1384_v12 = vld [vmem:[%s2525_s5 + $0x60] sm:$0xff]  ;;  %v1389_v13 = vld [vmem:[%s2525_s5 + $0xe8] sm:$0xff]  ;;  %v1408_v16 = vld [vmem:[%s2525_s5 + $0x158] sm:$0xff] }
   0x6   :  { %282 = vmatpush.msra.mxu3 %v1355_v7  ;;  %263 = vmatpush.msra.mxu2 %v1350_v6  ;;  %v1396_v14 = vld [vmem:[%s2525_s5 + $0x1e0] sm:$0xff]  ;;  %v1413_v17 = vld [vmem:[%s2525_s5 + $0x58] sm:$0xff]  ;;  %v1432_v20 = vld [vmem:[%s2525_s5 + $0x150] sm:$0xff] }
   0x7   :  { %242 = vmatpush.msra.mxu1 %v1367_v9  ;;  %223 = vmatpush.msra.mxu0 %v1360_v8  ;;  %v1401_v15 = vld [vmem:[%s2525_s5 + $0xe0] sm:$0xff]  ;;  %v1420_v18 = vld [vmem:[%s2525_s5 + $0x1d8] sm:$0xff]  ;;  %2693 = vst [vmem:[#allocation6_spill] sm:$0xff] %v1432_v20  ;;  %v1437_v21 = vld [vmem:[%s2525_s5 + $0x50] sm:$0xff] }
   0x8   :  { %283 = vmatpush.msra.mxu3 %v1372_v10  ;;  %264 = vmatpush.msra.mxu2 %v1379_v11  ;;  %v1425_v19 = vld [vmem:[%s2525_s5 + $0xd8] sm:$0xff]  ;;  %v1444_v22 = vld [vmem:[%s2525_s5 + $0x1d0] sm:$0xff]  ;;  %v1456_v24 = vld [vmem:[%s2525_s5 + $0x148] sm:$0xff] }
   0x9   :  { %243 = vmatpush.msra.mxu1 %v1389_v13  ;;  %224 = vmatpush.msra.mxu0 %v1384_v12  ;;  %v1449_v23 = vld [vmem:[%s2525_s5 + $0xd0] sm:$0xff]  ;;  %2694 = vst [vmem:[#allocation7_spill] sm:$0xff] %v1456_v24  ;;  %v1461_v25 = vld [vmem:[%s2525_s5 + $0x48] sm:$0xff]  ;;  %v1480_v28 = vld [vmem:[%s2525_s5 + $0x140] sm:$0xff] }
   0xa   :  { %284 = vmatpush.msra.mxu3 %v1396_v14  ;;  %265 = vmatpush.msra.mxu2 %v1408_v16  ;;  %v1468_v26 = vld [vmem:[%s2525_s5 + $0x1c8] sm:$0xff]  ;;  %2695 = vst [vmem:[#allocation8_spill] sm:$0xff] %v1480_v28  ;;  %v1485_v29 = vld [vmem:[%s2525_s5 + $0x40] sm:$0xff]  ;;  %v1504_v32 = vld [vmem:[%s2525_s5 + $0x138] sm:$0xff] }
   0xb   :  { %244 = vmatpush.msra.mxu1 %v1401_v15  ;;  %225 = vmatpush.msra.mxu0 %v1413_v17  ;;  %v1473_v27 = vld [vmem:[%s2525_s5 + $0xc8] sm:$0xff]  ;;  %v1492_v30 = vld [vmem:[%s2525_s5 + $0x1c0] sm:$0xff]  ;;  %2696 = vst [vmem:[#allocation9_spill] sm:$0xff] %v1504_v32  ;;  %v1509_v33 = vld [vmem:[%s2525_s5 + $0x38] sm:$0xff] }
   0xc   :  { %285 = vmatpush.msra.mxu3 %v1420_v18  ;;  %266 = vmatpush.msra.mxu2 %v1432_v20  ;;  %v1497_v31 = vld [vmem:[%s2525_s5 + $0xc0] sm:$0xff]  ;;  %v1516_v34 = vld [vmem:[%s2525_s5 + $0x1b8] sm:$0xff]  ;;  %v1528_v36 = vld [vmem:[%s2525_s5 + $0x130] sm:$0xff] }
   0xd   :  { %245 = vmatpush.msra.mxu1 %v1425_v19  ;;  %226 = vmatpush.msra.mxu0 %v1437_v21  ;;  %2697 = vst [vmem:[#allocation10_spill] sm:$0xff] %v1516_v34  ;;  %v1521_v35 = vld [vmem:[%s2525_s5 + $0xb8] sm:$0xff]  ;;  %v1533_v37 = vld [vmem:[%s2525_s5 + $0x30] sm:$0xff]  ;;  %v1552_v40 = vld [vmem:[%s2525_s5 + $0x128] sm:$0xff] }
   0xe   :  { %286 = vmatpush.msra.mxu3 %v1444_v22  ;;  %267 = vmatpush.msra.mxu2 %v1456_v24  ;;  %2698 = vst [vmem:[#allocation11_spill] sm:$0xff] %v1528_v36  ;;  %v1540_v38 = vld [vmem:[%s2525_s5 + $0x1b0] sm:$0xff]  ;;  %v1557_v41 = vld [vmem:[%s2525_s5 + $0x28] sm:$0xff]  ;;  %v1576_v44 = vld [vmem:[%s2525_s5 + $0x120] sm:$0xff] }
   0xf   :  { %246 = vmatpush.msra.mxu1 %v1449_v23  ;;  %227 = vmatpush.msra.mxu0 %v1461_v25  ;;  %2699 = vst [vmem:[#allocation12_spill] sm:$0xff] %v1540_v38  ;;  %v1545_v39 = vld [vmem:[%s2525_s5 + $0xb0] sm:$0xff]  ;;  %v1564_v42 = vld [vmem:[%s2525_s5 + $0x1a8] sm:$0xff]  ;;  %v1581_v45 = vld [vmem:[%s2525_s5 + $0x20] sm:$0xff] }
  0x10   :  { %287 = vmatpush.msra.mxu3 %v1468_v26  ;;  %268 = vmatpush.msra.mxu2 %v1480_v28  ;;  %2700 = vst [vmem:[#allocation13_spill] sm:$0xff] %v1552_v40  ;;  %v1569_v43 = vld [vmem:[%s2525_s5 + $0xa8] sm:$0xff]  ;;  %v1588_v46 = vld [vmem:[%s2525_s5 + $0x1a0] sm:$0xff]  ;;  %v1600_v48 = vld [vmem:[%s2525_s5 + $0x118] sm:$0xff] }
  0x11   :  { %247 = vmatpush.msra.mxu1 %v1473_v27  ;;  %228 = vmatpush.msra.mxu0 %v1485_v29  ;;  %2701 = vst [vmem:[#allocation14_spill] sm:$0xff] %v1564_v42  ;;  %v1593_v47 = vld [vmem:[%s2525_s5 + $0xa0] sm:$0xff]  ;;  %v1605_v49 = vld [vmem:[%s2525_s5 + $0x18] sm:$0xff]  ;;  %v1624_v52 = vld [vmem:[%s2525_s5 + $0x110] sm:$0xff] }
  0x12   :  { %288 = vmatpush.msra.mxu3 %v1492_v30  ;;  %269 = vmatpush.msra.mxu2 %v1504_v32  ;;  %2702 = vst [vmem:[#allocation15_spill] sm:$0xff] %v1576_v44  ;;  %v1612_v50 = vld [vmem:[%s2525_s5 + $0x198] sm:$0xff]  ;;  %v1629_v53 = vld [vmem:[%s2525_s5 + $0x10] sm:$0xff]  ;;  %v1648_v56 = vld [vmem:[%s2525_s5 + $0x108] sm:$0xff] }
  0x13   :  { %248 = vmatpush.msra.mxu1 %v1497_v31  ;;  %229 = vmatpush.msra.mxu0 %v1509_v33  ;;  %2703 = vst [vmem:[#allocation16_spill] sm:$0xff] %v1581_v45  ;;  %v1617_v51 = vld [vmem:[%s2525_s5 + $0x98] sm:$0xff]  ;;  %v1636_v54 = vld [vmem:[%s2525_s5 + $0x190] sm:$0xff]  ;;  %v1653_v57 = vld [vmem:[%s2525_s5 + $0x8] sm:$0xff] }
  0x14   :  { %289 = vmatpush.msra.mxu3 %v1516_v34  ;;  %270 = vmatpush.msra.mxu2 %v1528_v36  ;;  %2704 = vst [vmem:[#allocation17_spill] sm:$0xff] %v1588_v46  ;;  %v1641_v55 = vld [vmem:[%s2525_s5 + $0x90] sm:$0xff]  ;;  %v1660_v58 = vld [vmem:[%s2525_s5 + $0x188] sm:$0xff]  ;;  %v1672_v60 = vld [vmem:[%s2525_s5 + $0x100] sm:$0xff] }
  0x15   :  { %249 = vmatpush.msra.mxu1 %v1521_v35  ;;  %230 = vmatpush.msra.mxu0 %v1533_v37  ;;  %2705 = vst [vmem:[#allocation18_spill] sm:$0xff] %v1600_v48  ;;  %v1665_v59 = vld [vmem:[%s2525_s5 + $0x88] sm:$0xff]  ;;  %v1677_v61 = vld [vmem:[%s2525_s5] sm:$0xff]  ;;  %v1684_v62 = vld [vmem:[%s2525_s5 + $0x378] sm:$0xff] }
  0x16   :  { %290 = vmatpush.msra.mxu3 %v1540_v38  ;;  %271 = vmatpush.msra.mxu2 %v1552_v40  ;;  %2706 = vst [vmem:[#allocation19_spill] sm:$0xff] %v1605_v49  ;;  %v1689_v63 = vld [vmem:[%s2525_s5 + $0x180] sm:$0xff]  ;;  %v1876_v38 = vld [vmem:[%s2520_s0 + $0x8] sm:$0xff]  ;;  %v1920_v34 = vld [vmem:[%s2525_s5 + $0x3b8] sm:$0xff] }
  0x17   :  { %250 = vmatpush.msra.mxu1 %v1545_v39  ;;  %231 = vmatpush.msra.mxu0 %v1557_v41  ;;  %2707 = vst [vmem:[#allocation20_spill] sm:$0xff] %v1612_v50 }
  0x18   :  { %291 = vmatpush.msra.mxu3 %v1564_v42  ;;  %272 = vmatpush.msra.mxu2 %v1576_v44  ;;  %2708 = vst [vmem:[#allocation21_spill] sm:$0xff] %v1624_v52  ;;  %v1778_v42 = vld [vmem:[%s2520_s0] sm:$0xff] }
  0x19   :  { %251 = vmatpush.msra.mxu1 %v1569_v43  ;;  %232 = vmatpush.msra.mxu0 %v1581_v45  ;;  %2709 = vst [vmem:[#allocation22_spill] sm:$0xff] %v1629_v53 }
  0x1a   :  { %292 = vmatpush.msra.mxu3 %v1588_v46  ;;  %273 = vmatpush.msra.mxu2 %v1600_v48  ;;  %2710 = vst [vmem:[#allocation23_spill] sm:$0xff] %v1636_v54  ;;  %v1713_v46 = vld [vmem:[%s2525_s5 + $0x80] sm:$0xff] }
  0x1b   :  { %252 = vmatpush.msra.mxu1 %v1593_v47  ;;  %233 = vmatpush.msra.mxu0 %v1605_v49  ;;  %2711 = vst [vmem:[#allocation24_spill] sm:$0xff] %v1641_v55 }
  0x1c   :  { %293 = vmatpush.msra.mxu3 %v1612_v50  ;;  %2712 = vst [vmem:[#allocation25_spill] sm:$0xff] %v1648_v56  ;;  %274 = vmatpush.msra.mxu2 %v1624_v52  ;;  %v1701_v50 = vld [vmem:[%s2525_s5 + $0x3f8] sm:$0xff] }
  0x1d   :  { %253 = vmatpush.msra.mxu1 %v1617_v51  ;;  %2713 = vst [vmem:[#allocation26_spill] sm:$0xff] %v1653_v57  ;;  %234 = vmatpush.msra.mxu0 %v1629_v53  ;;  %v1859_v53 = vld [vmem:[%s2525_s5 + $0x3c8] sm:$0xff] }
  0x1e   :  { %2714 = vst [vmem:[#allocation27_spill] sm:$0xff] %v1660_v58  ;;  %294 = vmatpush.msra.mxu3 %v1636_v54  ;;  %275 = vmatpush.msra.mxu2 %v1648_v56  ;;  %v1696_v54 = vld [vmem:[%s2525_s5 + $0x278] sm:$0xff]  ;;  %v1842_v56 = vld [vmem:[%s2525_s5 + $0x248] sm:$0xff] }
  0x1f   :  { %2715 = vst [vmem:[#allocation28_spill] sm:$0xff] %v1665_v59  ;;  %254 = vmatpush.msra.mxu1 %v1641_v55  ;;  %235 = vmatpush.msra.mxu0 %v1653_v57  ;;  %v1761_v57 = vld [vmem:[%s2525_s5 + $0x3e8] sm:$0xff] }
  0x20   :  { %2716 = vst [vmem:[#allocation29_spill] sm:$0xff] %v1672_v60  ;;  %295 = vmatpush.msra.mxu3 %v1660_v58  ;;  %276 = vmatpush.msra.mxu2 %v1672_v60  ;;  %v1708_v58 = vld [vmem:[%s2525_s5 + $0x370] sm:$0xff] }
  0x21   :  { %2717 = vst [vmem:[#allocation30_spill] sm:$0xff] %v1677_v61  ;;  %255 = vmatpush.msra.mxu1 %v1665_v59  ;;  %236 = vmatpush.msra.mxu0 %v1677_v61  ;;  %v1720_v60 = vld [vmem:[%s2525_s5 + $0x270] sm:$0xff]  ;;  %v1725_v61 = vld [vmem:[%s2525_s5 + $0x2f8] sm:$0xff]  ;;  %v1893_v59 = vld [vmem:[%s2521_s1] sm:$0xff] }
  0x22   :  { %2718 = vst [vmem:[#allocation31_spill] sm:$0xff] %v1684_v62  ;;  %341 = vmatpush.msrb.mxu2 %v1684_v62  ;;  %296 = vmatpush.msra.mxu3 %v1689_v63  ;;  %v1732_v62 = vld [vmem:[%s2525_s5 + $0x368] sm:$0xff] }
  0x23   :  { %2719 = vst [vmem:[#allocation32_spill] sm:$0xff] %v1689_v63  ;;  %301 = vmatpush.msrb.mxu0 %v1696_v54  ;;  %v1737_v63 = vld [vmem:[%s2525_s5 + $0x3f0] sm:$0xff]  ;;  %256 = vmatpush.msra.mxu1 %v1713_v46 }
  0x24   :  { %2720 = vst [vmem:[#allocation33_spill] sm:$0xff] %v1696_v54  ;;  %361 = vmatpush.msrb.mxu3 %v1701_v50  ;;  %342 = vmatpush.msrb.mxu2 %v1708_v58  ;;  %v1744_v54 = vld [vmem:[%s2525_s5 + $0x268] sm:$0xff] }
  0x25   :  { %2721 = vst [vmem:[#allocation34_spill] sm:$0xff] %v1701_v50  ;;  %v1749_v50 = vld [vmem:[%s2525_s5 + $0x2f0] sm:$0xff]  ;;  %302 = vmatpush.msrb.mxu0 %v1720_v60  ;;  %321 = vmatpush.msrb.mxu1 %v1725_v61 }
  0x26   :  { %2722 = vst [vmem:[#allocation35_spill] sm:$0xff] %v1708_v58  ;;  %v1756_v58 = vld [vmem:[%s2525_s5 + $0x360] sm:$0xff]  ;;  %343 = vmatpush.msrb.mxu2 %v1732_v62  ;;  %362 = vmatpush.msrb.mxu3 %v1737_v63 }
  0x27   :  { %2723 = vst [vmem:[#allocation36_spill] sm:$0xff] %v1713_v46  ;;  %303 = vmatpush.msrb.mxu0 %v1744_v54  ;;  %322 = vmatpush.msrb.mxu1 %v1749_v50  ;;  %v1808_v46 = vld [vmem:[%s2525_s5 + $0x350] sm:$0xff] }
  0x28   :  { %2724 = vst [vmem:[#allocation37_spill] sm:$0xff] %v1720_v60  ;;  %v1768_v60 = vld [vmem:[%s2525_s5 + $0x260] sm:$0xff]  ;;  %344 = vmatpush.msrb.mxu2 %v1756_v58  ;;  %363 = vmatpush.msrb.mxu3 %v1761_v57 }
  0x29   :  { %2725 = vst [vmem:[#allocation38_spill] sm:$0xff] %v1725_v61  ;;  %v1773_v61 = vld [vmem:[%s2525_s5 + $0x2e8] sm:$0xff]  ;;  %304 = vmatpush.msrb.mxu0 %v1768_v60 }
  0x2a   :  { %2726 = vst [vmem:[#allocation39_spill] sm:$0xff] %v1732_v62  ;;  %v1790_v62 = vld [vmem:[%s2525_s5 + $0x3e0] sm:$0xff]  ;;  %323 = vmatpush.msrb.mxu1 %v1773_v61 }
  0x2b   :  { %2727 = vst [vmem:[#allocation40_spill] sm:$0xff] %v1737_v63  ;;  %v1785_v63 = vld [vmem:[%s2525_s5 + $0x358] sm:$0xff]  ;;  %364 = vmatpush.msrb.mxu3 %v1790_v62 }
  0x2c   :  { %2728 = vst [vmem:[#allocation41_spill] sm:$0xff] %v1744_v54  ;;  %v1798_v54 = vld [vmem:[%s2525_s5 + $0x258] sm:$0xff]  ;;  %345 = vmatpush.msrb.mxu2 %v1785_v63 }
  0x2d   :  { %2729 = vst [vmem:[#allocation42_spill] sm:$0xff] %v1749_v50  ;;  %v1803_v50 = vld [vmem:[%s2525_s5 + $0x2e0] sm:$0xff]  ;;  %305 = vmatpush.msrb.mxu0 %v1798_v54 }
  0x2e   :  { %2730 = vst [vmem:[#allocation43_spill] sm:$0xff] %v1756_v58  ;;  %v1825_v58 = vld [vmem:[%s2525_s5 + $0x2d8] sm:$0xff]  ;;  %324 = vmatpush.msrb.mxu1 %v1803_v50  ;;  %346 = vmatpush.msrb.mxu2 %v1808_v46 }
  0x2f   :  { %2731 = vst [vmem:[#allocation44_spill] sm:$0xff] %v1761_v57  ;;  %v1820_v57 = vld [vmem:[%s2525_s5 + $0x250] sm:$0xff] }
  0x30   :  { %2732 = vst [vmem:[#allocation45_spill] sm:$0xff] %v1768_v60  ;;  %v1832_v60 = vld [vmem:[%s2525_s5 + $0x348] sm:$0xff]  ;;  %306 = vmatpush.msrb.mxu0 %v1820_v57  ;;  %325 = vmatpush.msrb.mxu1 %v1825_v58 }
  0x31   :  { %2733 = vst [vmem:[#allocation46_spill] sm:$0xff] %v1773_v61  ;;  %v1837_v61 = vld [vmem:[%s2525_s5 + $0x3d0] sm:$0xff]  ;;  %347 = vmatpush.msrb.mxu2 %v1832_v60 }
  0x32   :  { %2734 = vst [vmem:[#allocation47_spill] sm:$0xff] %v1778_v42  ;;  %307 = vmatpush.msrb.mxu0 %v1842_v56 }
  0x33   :  { %2735 = vst [vmem:[#allocation48_spill] sm:$0xff] %v1785_v63  ;;  %v1854_v63 = vld [vmem:[%s2525_s5 + $0x340] sm:$0xff] }
  0x34   :  { %2736 = vst [vmem:[#allocation49_spill] sm:$0xff] %v1790_v62  ;;  %v1849_v62 = vld [vmem:[%s2525_s5 + $0x2d0] sm:$0xff]  ;;  %348 = vmatpush.msrb.mxu2 %v1854_v63 }
  0x35   :  { %202 = vst [vmem:[#allocation1] ss:$4 sm:$0xff] %v1778_v42  ;;  %v1815_v42 = vld [vmem:[%s2525_s5 + $0x3d8] sm:$0xff]  ;;  %326 = vmatpush.msrb.mxu1 %v1849_v62 }
  0x36   :  { %2737 = vst [vmem:[#allocation50_spill] sm:$0xff] %v1798_v54  ;;  %365 = vmatpush.msrb.mxu3 %v1815_v42  ;;  %v1866_v54 = vld [vmem:[%s2525_s5 + $0x240] sm:$0xff] }
  0x37   :  { %2738 = vst [vmem:[#allocation51_spill] sm:$0xff] %v1803_v50  ;;  %v1871_v50 = vld [vmem:[%s2525_s5 + $0x2c8] sm:$0xff]  ;;  %308 = vmatpush.msrb.mxu0 %v1866_v54 }
  0x38   :  { %2739 = vst [vmem:[#allocation52_spill] sm:$0xff] %v1808_v46  ;;  %v1888_v46 = vld [vmem:[%s2525_s5 + $0x3c0] sm:$0xff]  ;;  %366 = vmatpush.msrb.mxu3 %v1837_v61  ;;  %327 = vmatpush.msrb.mxu1 %v1871_v50 }
  0x39   :  { %2740 = vst [vmem:[#allocation53_spill] sm:$0xff] %v1815_v42  ;;  %v1883_v42 = vld [vmem:[%s2525_s5 + $0x338] sm:$0xff] }
  0x3a   :  { %2741 = vst [vmem:[#allocation54_spill] sm:$0xff] %v1820_v57  ;;  %v1901_v57 = vld [vmem:[%s2525_s5 + $0x238] sm:$0xff]  ;;  %367 = vmatpush.msrb.mxu3 %v1859_v53  ;;  %349 = vmatpush.msrb.mxu2 %v1883_v42 }
  0x3b   :  { %2742 = vst [vmem:[#allocation55_spill] sm:$0xff] %v1825_v58  ;;  %v1906_v58 = vld [vmem:[%s2525_s5 + $0x2c0] sm:$0xff] }
  0x3c   :  { %2743 = vst [vmem:[#allocation56_spill] sm:$0xff] %v1832_v60  ;;  %v207_v52 = vld.sshfl [vmem:[#allocation1 + $0x10] sm:$0xff pattern:$0x73625140]  ;;  %368 = vmatpush.msrb.mxu3 %v1888_v46 }
  0x3d   :  { %2744 = vst [vmem:[#allocation57_spill] sm:$0xff] %v1837_v61  ;;  %v205_v49 = vld.sshfl [vmem:[#allocation1] sm:$0xff pattern:$0x73625140] }
  0x3e   :  { %2745 = vst [vmem:[#allocation58_spill] sm:$0xff] %v1842_v56  ;;  %v208_v61 = vld.sshfl [vmem:[#allocation1 + $0x18] sm:$0xff pattern:$0x73625140]  ;;  %v1925_v56 = vld [vmem:[%s2525_s5 + $0x230] sm:$0xff] }
  0x3f   :  { %2746 = vst [vmem:[#allocation59_spill] sm:$0xff] %v1849_v62  ;;  %v206_v60 = vld.sshfl [vmem:[#allocation1 + $0x8] sm:$0xff pattern:$0x73625140]  ;;  %v1930_v62 = vld [vmem:[%s2525_s5 + $0x2b8] sm:$0xff] }
  0x40   :  { %2747 = vst [vmem:[#allocation60_spill] sm:$0xff] %v1854_v63  ;;  %v1943_v63 = vld [vmem:[%s2525_s5 + $0x3b0] sm:$0xff] }
  0x41   :  { %2748 = vst [vmem:[#allocation61_spill] sm:$0xff] %v1859_v53  ;;  %v1938_v53 = vld [vmem:[%s2525_s5 + $0x328] sm:$0xff] }
  0x42   :  { %2749 = vst [vmem:[#allocation62_spill] sm:$0xff] %v1866_v54  ;;  %v1955_v54 = vld [vmem:[%s2525_s5 + $0x2b0] sm:$0xff] }
  0x43   :  { %2750 = vst [vmem:[#allocation63_spill] sm:$0xff] %v1871_v50 }
  0x44   :  { %2751 = vst [vmem:[#allocation64_spill] sm:$0xff] %v1876_v38 }
  0x45   :  { %2752 = vst [vmem:[#allocation65_spill] sm:$0xff] %v1883_v42 }
  0x46   :  { %2753 = vst [vmem:[#allocation66_spill] sm:$0xff] %v1888_v46 }
  0x47   :  { %2754 = vst [vmem:[#allocation67_spill] sm:$0xff] %v1893_v59 }
  0x48   :  { %204 = vst [vmem:[#allocation1 + $0x20] ss:$4 sm:$0xff] %v1876_v38  ;;  %v1913_v38 = vld [vmem:[%s2525_s5 + $0x330] sm:$0xff] }
  0x49   :  { %2755 = vst [vmem:[#allocation68_spill] sm:$0xff] %v1901_v57 }
  0x4a   :  { %2756 = vst [vmem:[#allocation69_spill] sm:$0xff] %v1906_v58 }
  0x4b   :  { %2757 = vst [vmem:[#allocation70_spill] sm:$0xff] %v1913_v38 }
  0x4c   :  { %2758 = vst [vmem:[#allocation71_spill] sm:$0xff] %v1920_v34 }
  0x4d   :  { %411 = vst [vmem:[#allocation1] ss:$4 sm:$0xff] %v1893_v59  ;;  %v1950_v59 = vld [vmem:[%s2525_s5 + $0x228] sm:$0xff] }
  0x4e   :  { %2759 = vst [vmem:[#allocation72_spill] sm:$0xff] %v1938_v53 }
  0x4f   :  { %2760 = vst [vmem:[#allocation73_spill] sm:$0xff] %v1943_v63 }
  0x50   :  { %2761 = vst [vmem:[#allocation74_spill] sm:$0xff] %v1950_v59 }
  0x51   :  { %16 = vsyncpa [#allocation4], 0  ;;  %309 = vmatpush.msrb.mxu0 %v1901_v57  ;;  %328 = vmatpush.msrb.mxu1 %v1906_v58  ;;  %v1962_v42 = vld [vmem:[%s2525_s5 + $0x320] sm:$0xff]  ;;  %v1967_v46 = vld [vmem:[%s2525_s5 + $0x3a8] sm:$0xff]  ;;  %vm385_vm0 = vcmask 261120   ;;  %vm987_vm1 = vcmask 33800  }
  0x52   :  { %2762 = vst [vmem:[#allocation75_spill] sm:$0xff] %v1962_v42  ;;  %v1972_v50 = vld [vmem:[%s2521_s1 + $0x8] sm:$0xff]  ;;  %350 = vmatpush.msrb.mxu2 %v1913_v38  ;;  %369 = vmatpush.msrb.mxu3 %v1920_v34  ;;  %v211_v57 = vld.sshfl [vmem:[#allocation1 + $0x30] sm:$0xff pattern:$0x73625140]  ;;  %v1983_v45 = vld [vmem:[%s2525_s5 + $0x220] sm:$0xff] }
  0x53   :  { %2763 = vst [vmem:[#allocation76_spill] sm:$0xff] %v1967_v46  ;;  %v209_v58 = vld.sshfl [vmem:[#allocation1 + $0x20] sm:$0xff pattern:$0x73625140]  ;;  %310 = vmatpush.msrb.mxu0 %v1925_v56  ;;  %329 = vmatpush.msrb.mxu1 %v1930_v62  ;;  %v1991_v34 = vld [vmem:[%s2525_s5 + $0x2a8] sm:$0xff]  ;;  %s1248_s28 = smov 127  }
  0x54   :  { %2764 = vst [vmem:[#allocation77_spill] sm:$0xff] %v1972_v50  ;;  %v212_v55 = vld.sshfl [vmem:[#allocation1 + $0x38] sm:$0xff pattern:$0x73625140]  ;;  %351 = vmatpush.msrb.mxu2 %v1938_v53  ;;  %370 = vmatpush.msrb.mxu3 %v1943_v63  ;;  %s1249_s13 = smov 5   ;;  %vm998_vm3 = vcmask 25600  }
  0x55   :  { %v210_v48 = vld.sshfl [vmem:[#allocation1 + $0x28] sm:$0xff pattern:$0x73625140]  ;;  %2765 = vst [vmem:[#allocation78_spill] sm:$0xff] %v1983_v45  ;;  %311 = vmatpush.msrb.mxu0 %v1950_v59  ;;  %330 = vmatpush.msrb.mxu1 %v1955_v54  ;;  %v1996_v63 = vld [vmem:[%s2525_s5 + $0x318] sm:$0xff]  ;;  %vm884_vm4 = vcmask 254976  }
  0x56   :  { %413 = vst [vmem:[#allocation1 + $0x20] ss:$4 sm:$0xff] %v1972_v50  ;;  %352 = vmatpush.msrb.mxu2 %v1962_v42  ;;  %371 = vmatpush.msrb.mxu3 %v1967_v46  ;;  %v2003_v50 = vld [vmem:[%s2525_s5 + $0x3a0] sm:$0xff]  ;;  %v2009_v59 = vld [vmem:[%s2525_s5 + $0x218] sm:$0xff]  ;;  %vm903_vm9 = vcmask 1024   ;;  %vm1077_vm14 = vcmask 9216  }
  0x57   :  { %2766 = vst [vmem:[#allocation79_spill] sm:$0xff] %v1991_v34  ;;  %277 = vmatmul.f32.vlgmr.msra.gmra.mxu2 %v207_v52  ;;  %312 = vmatpush.msrb.mxu0 %v1983_v45  ;;  %v2016_v46 = vld [vmem:[%s2525_s5 + $0x2a0] sm:$0xff]  ;;  %v2021_v52 = vld [vmem:[%s2525_s5 + $0x310] sm:$0xff]  ;;  %v2027_v45 = vld [vmem:[%s2525_s5 + $0x398] sm:$0xff]  ;;  %s1252_s18 = smov [#allocation3]  }
  0x58   :  { %2767 = vst [vmem:[#allocation80_spill] sm:$0xff] %v1996_v63  ;;  %331 = vmatpush.msrb.mxu1 %v1991_v34  ;;  %353 = vmatpush.msrb.mxu2 %v1996_v63  ;;  %v2033_v63 = vld [vmem:[%s2525_s5 + $0x210] sm:$0xff]  ;;  %v2038_v42 = vld [vmem:[%s2525_s5 + $0x298] sm:$0xff] }
  0x59   :  { %2768 = vst [vmem:[#allocation81_spill] sm:$0xff] %v2003_v50  ;;  %372 = vmatpush.msrb.mxu3 %v2003_v50  ;;  %237 = vmatmul.f32.vlgmr.msra.gmra.mxu0 %v205_v49  ;;  %v2045_v49 = vld [vmem:[%s2525_s5 + $0x308] sm:$0xff] }
  0x5a   :  { %2769 = vst [vmem:[#allocation82_spill] sm:$0xff] %v2009_v59  ;;  %297 = vmatmul.f32.vlgmr.msra.gmra.mxu3 %v208_v61  ;;  %313 = vmatpush.msrb.mxu0 %v2009_v59  ;;  %v2050_v61 = vld [vmem:[%s2525_s5 + $0x390] sm:$0xff]  ;;  %v2056_v50 = vld [vmem:[%s2525_s5 + $0x208] sm:$0xff]  ;;  %v2068_v59 = vld [vmem:[%s2525_s5 + $0x300] sm:$0xff] }
  0x5b   :  { %2770 = vst [vmem:[#allocation83_spill] sm:$0xff] %v2016_v46  ;;  %332 = vmatpush.msrb.mxu1 %v2016_v46  ;;  %354 = vmatpush.msrb.mxu2 %v2021_v52 }
  0x5c   :  { %2771 = vst [vmem:[#allocation84_spill] sm:$0xff] %v2021_v52  ;;  %373 = vmatpush.msrb.mxu3 %v2027_v45  ;;  %257 = vmatmul.f32.vlgmr.msra.gmra.mxu1 %v206_v60  ;;  %v2061_v52 = vld [vmem:[%s2525_s5 + $0x290] sm:$0xff]  ;;  %v2073_v60 = vld [vmem:[%s2525_s5 + $0x388] sm:$0xff] }
  0x5d   :  { %2772 = vst [vmem:[#allocation85_spill] sm:$0xff] %v2027_v45  ;;  %314 = vmatpush.msrb.mxu0 %v2033_v63  ;;  %333 = vmatpush.msrb.mxu1 %v2038_v42  ;;  %v2080_v45 = vld [vmem:[%s2525_s5 + $0x200] sm:$0xff] }
  0x5e   :  { %2773 = vst [vmem:[#allocation86_spill] sm:$0xff] %v2033_v63  ;;  %355 = vmatpush.msrb.mxu2 %v2045_v49  ;;  %374 = vmatpush.msrb.mxu3 %v2050_v61  ;;  %v2087_v63 = vld [vmem:[%s2525_s5 + $0x288] sm:$0xff] }
  0x5f   :  { %2774 = vst [vmem:[#allocation87_spill] sm:$0xff] %v2038_v42  ;;  %315 = vmatpush.msrb.mxu0 %v2056_v50  ;;  %334 = vmatpush.msrb.mxu1 %v2061_v52 }
  0x60   :  { %2775 = vst [vmem:[#allocation88_spill] sm:$0xff] %v2045_v49  ;;  %v2092_v49 = vld [vmem:[%s2525_s5 + $0x380] sm:$0xff]  ;;  %356 = vmatpush.msrb.mxu2 %v2068_v59  ;;  %375 = vmatpush.msrb.mxu3 %v2073_v60 }
  0x61   :  { %2776 = vst [vmem:[#allocation89_spill] sm:$0xff] %v2050_v61  ;;  %357 = vmatmul.f32.vlgmr.msrb.gmra.mxu2 %v211_v57  ;;  %316 = vmatpush.msrb.mxu0 %v2080_v45  ;;  %v2100_v61 = vld [vmem:[%s2525_s5 + $0x280] sm:$0xff]  ;;  %v2115_v57 = vld [vmem:[%s2527_s7 + $0x10] sm:$0xff] }
  0x62   :  { %2777 = vst [vmem:[#allocation90_spill] sm:$0xff] %v2056_v50  ;;  %335 = vmatpush.msrb.mxu1 %v2087_v63  ;;  %376 = vmatpush.msrb.mxu3 %v2092_v49 }
  0x63   :  { %2778 = vst [vmem:[#allocation91_spill] sm:$0xff] %v2061_v52  ;;  %317 = vmatmul.f32.vlgmr.msrb.gmra.mxu0 %v209_v58  ;;  %377 = vmatmul.f32.vlgmr.msrb.gmra.mxu3 %v212_v55  ;;  %v2124_v55 = vld [vmem:[%s2527_s7 + $0x8] sm:$0xff]  ;;  %v2790_v58 = vld [vmem:[#allocation21_spill] sm:$0xff] }
  0x64   :  { %2779 = vst [vmem:[#allocation92_spill] sm:$0xff] %v2068_v59  ;;  %v2107_v59 = vld [vmem:[%s2527_s7 + $0x18] sm:$0xff]  ;;  %336 = vmatpush.msrb.mxu1 %v2100_v61  ;;  %450 = vmatpush.msra.mxu2 %v1343_v5 }
  0x65   :  { %2780 = vst [vmem:[#allocation93_spill] sm:$0xff] %v2073_v60  ;;  %337 = vmatmul.f32.vlgmr.msrb.gmra.mxu1 %v210_v48  ;;  %470 = vmatpush.msra.mxu3 %v1316_v0  ;;  %v2133_v0 = vld [vmem:[%s2527_s7] sm:$0xff]  ;;  %v2789_v48 = vld [vmem:[#allocation19_spill] sm:$0xff] }
  0x66   :  { %2781 = vst [vmem:[#allocation94_spill] sm:$0xff] %v2080_v45  ;;  %451 = vmatpush.msra.mxu2 %v1367_v9  ;;  %401 = vmatpush.msra.mxu0 %v2107_v59  ;;  %v2800_v60 = vld [vmem:[#allocation17_spill] sm:$0xff] }
  0x67   :  { %2782 = vst [vmem:[#allocation95_spill] sm:$0xff] %v2087_v63  ;;  %430 = vmatpush.msra.mxu1 %v1321_v1  ;;  %471 = vmatpush.msra.mxu3 %v1326_v2  ;;  %v2785_v2 = vld [vmem:[#allocation16_spill] sm:$0xff] }
  0x68   :  { %2783 = vst [vmem:[#allocation96_spill] sm:$0xff] %v2092_v49  ;;  %452 = vmatpush.msra.mxu2 %v1389_v13  ;;  %402 = vmatpush.msra.mxu0 %v2115_v57  ;;  %v2799_v49 = vld [vmem:[#allocation29_spill] sm:$0xff] }
  0x69   :  { %2784 = vst [vmem:[#allocation97_spill] sm:$0xff] %v2100_v61  ;;  %431 = vmatpush.msra.mxu1 %v1338_v4  ;;  %472 = vmatpush.msra.mxu3 %v1350_v6  ;;  %v2786_v6 = vld [vmem:[#allocation18_spill] sm:$0xff] }
  0x6a   :  { %453 = vmatpush.msra.mxu2 %v1401_v15  ;;  %403 = vmatpush.msra.mxu0 %v2124_v55 }
  0x6b   :  { %432 = vmatpush.msra.mxu1 %v1360_v8  ;;  %473 = vmatpush.msra.mxu3 %v1379_v11  ;;  %v2787_v11 = vld [vmem:[#allocation24_spill] sm:$0xff] }
  0x6c   :  { %454 = vmatpush.msra.mxu2 %v1425_v19  ;;  %404 = vmatpush.msra.mxu0 %v2133_v0 }
  0x6d   :  { %433 = vmatpush.msra.mxu1 %v1384_v12  ;;  %474 = vmatpush.msra.mxu3 %v1408_v16  ;;  %v2788_v16 = vld [vmem:[#allocation10_spill] sm:$0xff] }
  0x6e   :  { %455 = vmatpush.msra.mxu2 %v1449_v23  ;;  %490 = vmatpush.msrb.mxu0 %v1333_v3 }
  0x6f   :  { %434 = vmatpush.msra.mxu1 %v1413_v17  ;;  %475 = vmatpush.msra.mxu3 %v1432_v20  ;;  %v2798_v20 = vld [vmem:[#allocation26_spill] sm:$0xff] }
  0x70   :  { %456 = vmatpush.msra.mxu2 %v1473_v27  ;;  %491 = vmatpush.msrb.mxu0 %v1355_v7 }
  0x71   :  { %435 = vmatpush.msra.mxu1 %v1437_v21  ;;  %476 = vmatpush.msra.mxu3 %v1456_v24  ;;  %v2796_v24 = vld [vmem:[#allocation14_spill] sm:$0xff] }
  0x72   :  { %457 = vmatpush.msra.mxu2 %v1497_v31  ;;  %492 = vmatpush.msrb.mxu0 %v1372_v10 }
  0x73   :  { %436 = vmatpush.msra.mxu1 %v1461_v25  ;;  %477 = vmatpush.msra.mxu3 %v1480_v28  ;;  %v2795_v28 = vld [vmem:[#allocation36_spill] sm:$0xff] }
  0x74   :  { %458 = vmatpush.msra.mxu2 %v1521_v35  ;;  %493 = vmatpush.msrb.mxu0 %v1396_v14 }
  0x75   :  { %437 = vmatpush.msra.mxu1 %v1485_v29  ;;  %478 = vmatpush.msra.mxu3 %v1504_v32  ;;  %v2794_v32 = vld [vmem:[#allocation25_spill] sm:$0xff] }
  0x76   :  { %459 = vmatpush.msra.mxu2 %v1545_v39  ;;  %494 = vmatpush.msrb.mxu0 %v1420_v18 }
  0x77   :  { %438 = vmatpush.msra.mxu1 %v1509_v33  ;;  %479 = vmatpush.msra.mxu3 %v1528_v36  ;;  %v2792_v36 = vld [vmem:[#allocation12_spill] sm:$0xff] }
  0x78   :  { %460 = vmatpush.msra.mxu2 %v1569_v43  ;;  %495 = vmatpush.msrb.mxu0 %v1444_v22 }
  0x79   :  { %439 = vmatpush.msra.mxu1 %v1533_v37  ;;  %480 = vmatpush.msra.mxu3 %v1552_v40  ;;  %v2791_v40 = vld [vmem:[#allocation28_spill] sm:$0xff] }
  0x7a   :  { %461 = vmatpush.msra.mxu2 %v1593_v47  ;;  %496 = vmatpush.msrb.mxu0 %v1468_v26 }
  0x7b   :  { %440 = vmatpush.msra.mxu1 %v1557_v41  ;;  %481 = vmatpush.msra.mxu3 %v1576_v44  ;;  %v2793_v44 = vld [vmem:[#allocation22_spill] sm:$0xff] }
  0x7c   :  { %462 = vmatpush.msra.mxu2 %v1617_v51  ;;  %497 = vmatpush.msrb.mxu0 %v1492_v30 }
  0x7d   :  { %441 = vmatpush.msra.mxu1 %v2785_v2  ;;  %482 = vmatpush.msra.mxu3 %v2786_v6  ;;  %v2797_v6 = vld [vmem:[#allocation38_spill] sm:$0xff] }
  0x7e   :  { %463 = vmatpush.msra.mxu2 %v2787_v11  ;;  %498 = vmatpush.msrb.mxu0 %v2788_v16  ;;  %v2804_v16 = vld [vmem:[#allocation20_spill] sm:$0xff]  ;;  %v2809_v11 = vld [vmem:[#allocation37_spill] sm:$0xff] }
  0x7f   :  { %442 = vmatpush.msra.mxu1 %v2789_v48  ;;  %483 = vmatpush.msra.mxu3 %v2790_v58  ;;  %v2801_v58 = vld [vmem:[#allocation42_spill] sm:$0xff] }
  0x80   :  { %464 = vmatpush.msra.mxu2 %v2791_v40  ;;  %499 = vmatpush.msrb.mxu0 %v2792_v36  ;;  %v2802_v40 = vld [vmem:[#allocation31_spill] sm:$0xff]  ;;  %v2803_v36 = vld [vmem:[#allocation30_spill] sm:$0xff] }
  0x81   :  { %443 = vmatpush.msra.mxu1 %v2793_v44  ;;  %484 = vmatpush.msra.mxu3 %v2794_v32  ;;  %v2805_v32 = vld [vmem:[#allocation33_spill] sm:$0xff] }
  0x82   :  { %465 = vmatpush.msra.mxu2 %v2795_v28  ;;  %500 = vmatpush.msrb.mxu0 %v2796_v24  ;;  %v2806_v28 = vld [vmem:[#allocation46_spill] sm:$0xff]  ;;  %v2807_v24 = vld [vmem:[#allocation35_spill] sm:$0xff] }
  0x83   :  { %444 = vmatpush.msra.mxu1 %v2798_v20  ;;  %485 = vmatpush.msra.mxu3 %v2799_v49  ;;  %v2810_v49 = vld [vmem:[#allocation51_spill] sm:$0xff] }
  0x84   :  { %530 = vmatpush.msrb.mxu2 %v2797_v6  ;;  %501 = vmatpush.msrb.mxu0 %v2800_v60  ;;  %v2808_v6 = vld [vmem:[#allocation23_spill] sm:$0xff] }
  0x85   :  { %550 = vmatpush.msrb.mxu3 %v2802_v40  ;;  %445 = vmatpush.msra.mxu1 %v2803_v36  ;;  %v2811_v60 = vld [vmem:[#allocation39_spill] sm:$0xff]  ;;  %v2813_v40 = vld [vmem:[#allocation41_spill] sm:$0xff] }
  0x86   :  { %531 = vmatpush.msrb.mxu2 %v2801_v58  ;;  %502 = vmatpush.msrb.mxu0 %v2804_v16  ;;  %v2812_v58 = vld [vmem:[#allocation27_spill] sm:$0xff] }
  0x87   :  { %510 = vmatpush.msrb.mxu1 %v2805_v32  ;;  %551 = vmatpush.msrb.mxu3 %v2807_v24  ;;  %v2814_v36 = vld [vmem:[#allocation55_spill] sm:$0xff]  ;;  %v2816_v32 = vld [vmem:[#allocation32_spill] sm:$0xff] }
  0x88   :  { %532 = vmatpush.msrb.mxu2 %v2806_v28  ;;  %503 = vmatpush.msrb.mxu0 %v2808_v6  ;;  %v2815_v16 = vld [vmem:[#allocation43_spill] sm:$0xff]  ;;  %v2817_v28 = vld [vmem:[#allocation45_spill] sm:$0xff]  ;;  %v2819_v6 = vld [vmem:[#allocation48_spill] sm:$0xff] }
  0x89   :  { %511 = vmatpush.msrb.mxu1 %v2809_v11  ;;  %552 = vmatpush.msrb.mxu3 %v2811_v60  ;;  %v2818_v24 = vld [vmem:[#allocation59_spill] sm:$0xff]  ;;  %v2820_v11 = vld [vmem:[#allocation50_spill] sm:$0xff]  ;;  %v2822_v60 = vld [vmem:[#allocation52_spill] sm:$0xff] }
  0x8a   :  { %533 = vmatpush.msrb.mxu2 %v2810_v49  ;;  %504 = vmatpush.msrb.mxu0 %v2812_v58  ;;  %v2821_v49 = vld [vmem:[#allocation63_spill] sm:$0xff]  ;;  %v2823_v58 = vld [vmem:[#allocation54_spill] sm:$0xff] }
  0x8b   :  { %512 = vmatpush.msrb.mxu1 %v2813_v40  ;;  %553 = vmatpush.msrb.mxu3 %v2815_v16  ;;  %v2824_v40 = vld [vmem:[#allocation69_spill] sm:$0xff]  ;;  %v2826_v16 = vld [vmem:[#allocation58_spill] sm:$0xff] }
  0x8c   :  { %534 = vmatpush.msrb.mxu2 %v2814_v36  ;;  %505 = vmatpush.msrb.mxu0 %v2816_v32  ;;  %v2825_v36 = vld [vmem:[#allocation56_spill] sm:$0xff] }
  0x8d   :  { %513 = vmatpush.msrb.mxu1 %v2817_v28  ;;  %554 = vmatpush.msrb.mxu3 %v2819_v6  ;;  %v2827_v32 = vld [vmem:[#allocation60_spill] sm:$0xff]  ;;  %v2829_v6 = vld [vmem:[#allocation65_spill] sm:$0xff] }
  0x8e   :  { %535 = vmatpush.msrb.mxu2 %v2818_v24  ;;  %v2828_v24 = vld [vmem:[#allocation62_spill] sm:$0xff] }
  0x8f   :  { %514 = vmatpush.msrb.mxu1 %v2820_v11  ;;  %555 = vmatpush.msrb.mxu3 %v2822_v60  ;;  %v2833_v60 = vld [vmem:[#allocation78_spill] sm:$0xff] }
  0x90   :  { %536 = vmatpush.msrb.mxu2 %v2821_v49  ;;  %v2830_v49 = vld [vmem:[#allocation68_spill] sm:$0xff] }
  0x91   :  { %515 = vmatpush.msrb.mxu1 %v2823_v58  ;;  %556 = vmatpush.msrb.mxu3 %v2825_v36  ;;  %v2831_v36 = vld [vmem:[#allocation74_spill] sm:$0xff] }
  0x92   :  { %537 = vmatpush.msrb.mxu2 %v2824_v40 }
  0x93   :  { %516 = vmatpush.msrb.mxu1 %v2826_v16  ;;  %557 = vmatpush.msrb.mxu3 %v2827_v32  ;;  %v2832_v32 = vld [vmem:[#allocation75_spill] sm:$0xff] }
  0x94   :  { %538 = vmatpush.msrb.mxu2 %v1930_v62 }
  0x95   :  { %517 = vmatpush.msrb.mxu1 %v2828_v24  ;;  %558 = vmatpush.msrb.mxu3 %v2829_v6  ;;  %v2834_v6 = vld [vmem:[#allocation80_spill] sm:$0xff] }
  0x96   :  { %539 = vmatpush.msrb.mxu2 %v1955_v54 }
  0x97   :  { %518 = vmatpush.msrb.mxu1 %v2830_v49  ;;  %559 = vmatpush.msrb.mxu3 %v1913_v38  ;;  %v2836_v38 = vld [vmem:[#allocation84_spill] sm:$0xff] }
  0x98   :  { %540 = vmatpush.msrb.mxu2 %v1991_v34  ;;  %v2835_v34 = vld [vmem:[#allocation82_spill] sm:$0xff] }
  0x99   :  { %519 = vmatpush.msrb.mxu1 %v1925_v56  ;;  %560 = vmatpush.msrb.mxu3 %v1938_v53  ;;  %v2838_v53 = vld [vmem:[#allocation88_spill] sm:$0xff] }
  0x9a   :  { %541 = vmatpush.msrb.mxu2 %v2016_v46  ;;  %v2837_v46 = vld [vmem:[#allocation86_spill] sm:$0xff] }
  0x9b   :  { %520 = vmatpush.msrb.mxu1 %v2831_v36  ;;  %561 = vmatpush.msrb.mxu3 %v2832_v32  ;;  %v2839_v32 = vld [vmem:[#allocation92_spill] sm:$0xff] }
  0x9c   :  { %542 = vmatpush.msrb.mxu2 %v2038_v42 }
  0x9d   :  { %521 = vmatpush.msrb.mxu1 %v2833_v60  ;;  %562 = vmatpush.msrb.mxu3 %v2834_v6  ;;  %v2244_v6 = vld [vmem:[%s2526_s6] ss:$0 sm:$0xff]  ;;  %s1157_s6 = sshll.u32 %s2531_s11, 4  ;;  %s1158_s6 = int_to_ptr.hbm [resolvable:$true] %s1157_s6 }
  0x9e   :  { %543 = vmatpush.msrb.mxu2 %v2061_v52  ;;  %v415_v52 = vld.sshfl [vmem:[#allocation1 + $0x8] sm:$0xff pattern:$0x73625140] }
  0x9f   :  { %522 = vmatpush.msrb.mxu1 %v2835_v34  ;;  %563 = vmatpush.msrb.mxu3 %v2836_v38 }
  0xa0   :  { %544 = vmatpush.msrb.mxu2 %v2087_v63 }
  0xa1   :  { %523 = vmatpush.msrb.mxu1 %v2837_v46  ;;  %564 = vmatpush.msrb.mxu3 %v2838_v53  ;;  %v416_v53 = vld.sshfl [vmem:[#allocation1 + $0x10] sm:$0xff pattern:$0x73625140] }
  0xa2   :  { %545 = vmatpush.msrb.mxu2 %v2100_v61  ;;  %486 = vmatmul.f32.vlgmr.msra.gmra.mxu3 %v416_v53  ;;  %v2864_v53 = vld [vmem:[#allocation41_spill] sm:$0xff] }
  0xa3   :  { %524 = vmatpush.msrb.mxu1 %v2056_v50  ;;  %565 = vmatpush.msrb.mxu3 %v2839_v32  ;;  %v414_v50 = vld.sshfl [vmem:[#allocation1] sm:$0xff pattern:$0x73625140] }
  0xa4   :  { %466 = vmatmul.f32.vlgmr.msra.gmra.mxu2 %v415_v52  ;;  %446 = vmatmul.f32.vlgmr.msra.gmra.mxu1 %v414_v50  ;;  %v2862_v50 = vld [vmem:[#allocation38_spill] sm:$0xff]  ;;  %v2867_v52 = vld [vmem:[#allocation20_spill] sm:$0xff] }
  0xa5   :  { %525 = vmatpush.msrb.mxu1 %v2080_v45  ;;  %688 = vmatpush.msra.mxu2 %v1321_v1 }
  0xa6   :  { %708 = vmatpush.msra.mxu3 %v1343_v5  ;;  %v417_v5 = vld.sshfl [vmem:[#allocation1 + $0x18] sm:$0xff pattern:$0x73625140] }
  0xa7   :  { %689 = vmatpush.msra.mxu2 %v1338_v4  ;;  %606 = vmatpush.msra.mxu1 %v2107_v59  ;;  %v2865_v59 = vld [vmem:[#allocation81_spill] sm:$0xff] }
  0xa8   :  { %709 = vmatpush.msra.mxu3 %v1367_v9  ;;  %v2840_v9 = vld [vmem:[#allocation67_spill] sm:$0xff] }
  0xa9   :  { %690 = vmatpush.msra.mxu2 %v1360_v8  ;;  %607 = vmatpush.msra.mxu1 %v2115_v57  ;;  %620 = vst [vmem:[#allocation1] ss:$4 sm:$0xff] %v2840_v9  ;;  %v2869_v57 = vld [vmem:[#allocation46_spill] sm:$0xff]  ;;  %v2888_v9 = vld [vmem:[#allocation8_spill] sm:$0xff] }
  0xaa   :  { %710 = vmatpush.msra.mxu3 %v1389_v13 }
  0xab   :  { %691 = vmatpush.msra.mxu2 %v1384_v12  ;;  %608 = vmatpush.msra.mxu1 %v2124_v55  ;;  %v2870_v55 = vld [vmem:[#allocation23_spill] sm:$0xff] }
  0xac   :  { %711 = vmatpush.msra.mxu3 %v1401_v15 }
  0xad   :  { %692 = vmatpush.msra.mxu2 %v1413_v17  ;;  %609 = vmatpush.msra.mxu1 %v2133_v0  ;;  %v2871_v0 = vld [vmem:[#allocation89_spill] sm:$0xff] }
  0xae   :  { %712 = vmatpush.msra.mxu3 %v1425_v19  ;;  %v2271_v19 = vld.sshfl [vmem:[#allocation1 + $0x38] sm:$0xff pattern:$0x73625140] }
  0xaf   :  { %693 = vmatpush.msra.mxu2 %v1437_v21  ;;  %v2841_v21 = vld [vmem:[#allocation34_spill] sm:$0xff] }
  0xb0   :  { %713 = vmatpush.msra.mxu3 %v1449_v23  ;;  %v2842_v23 = vld [vmem:[#allocation77_spill] sm:$0xff] }
  0xb1   :  { %694 = vmatpush.msra.mxu2 %v1461_v25  ;;  %v1247_v25 = vmov 0  }
  0xb2   :  { %714 = vmatpush.msra.mxu3 %v1473_v27  ;;  %1204 = vset.pattern.permute.xlu0 %v1247_v25  ;;  %v2844_v27 = vld [vmem:[#allocation44_spill] sm:$0xff]  ;;  %v2899_v25 = vld [vmem:[#allocation25_spill] sm:$0xff] }
  0xb3   :  { %695 = vmatpush.msra.mxu2 %v1485_v29 }
  0xb4   :  { %715 = vmatpush.msra.mxu3 %v1497_v31  ;;  %v2846_v31 = vld [vmem:[#allocation53_spill] sm:$0xff] }
  0xb5   :  { %696 = vmatpush.msra.mxu2 %v1509_v33  ;;  %v2850_v33 = vld [vmem:[#allocation24_spill] sm:$0xff] }
  0xb6   :  { %716 = vmatpush.msra.mxu3 %v1521_v35  ;;  %v2851_v35 = vld [vmem:[#allocation10_spill] sm:$0xff] }
  0xb7   :  { %697 = vmatpush.msra.mxu2 %v1533_v37  ;;  %v2852_v37 = vld [vmem:[#allocation30_spill] sm:$0xff] }
  0xb8   :  { %717 = vmatpush.msra.mxu3 %v1545_v39  ;;  %v2853_v39 = vld [vmem:[#allocation71_spill] sm:$0xff] }
  0xb9   :  { %698 = vmatpush.msra.mxu2 %v1557_v41  ;;  %v2855_v41 = vld [vmem:[#allocation12_spill] sm:$0xff] }
  0xba   :  { %718 = vmatpush.msra.mxu3 %v1569_v43  ;;  %v2856_v43 = vld [vmem:[#allocation33_spill] sm:$0xff] }
  0xbb   :  { %699 = vmatpush.msra.mxu2 %v2785_v2  ;;  %v2872_v2 = vld [vmem:[#allocation51_spill] sm:$0xff] }
  0xbc   :  { %719 = vmatpush.msra.mxu3 %v1593_v47  ;;  %v2861_v47 = vld [vmem:[#allocation76_spill] sm:$0xff] }
  0xbd   :  { %700 = vmatpush.msra.mxu2 %v2789_v48  ;;  %v2873_v48 = vld [vmem:[#allocation27_spill] sm:$0xff] }
  0xbe   :  { %720 = vmatpush.msra.mxu3 %v1617_v51  ;;  %v2863_v51 = vld [vmem:[#allocation17_spill] sm:$0xff] }
  0xbf   :  { %701 = vmatpush.msra.mxu2 %v2793_v44  ;;  %v2857_v44 = vld [vmem:[#allocation73_spill] sm:$0xff] }
  0xc0   :  { %721 = vmatpush.msra.mxu3 %v2850_v33  ;;  %v2902_v33 = vld [vmem:[#allocation35_spill] sm:$0xff] }
  0xc1   :  { %702 = vmatpush.msra.mxu2 %v2798_v20  ;;  %v2859_v20 = vld [vmem:[#allocation14_spill] sm:$0xff] }
  0xc3   :  { %703 = vmatpush.msra.mxu2 %v2852_v37  ;;  %v2904_v37 = vld [vmem:[#allocation43_spill] sm:$0xff] }
  0xd6   :  { %v238_v63 = vpop.f32.mrf.mxu0 }
  0xd7   :  { %v239_v38 = vadd.f32 %v2244_v6, %v238_v63  ;;  %v2866_v63 = vld [vmem:[#allocation42_spill] sm:$0xff] }
  0xd9   :  { %v258_v42 = vpop.f32.mrf.mxu1 }
  0xda   :  { %v259_v61 = vadd.f32 %v258_v42, %v239_v38  ;;  %v278_v46 = vpop.f32.mrf.mxu2  ;;  %v419_v42 = vld.sshfl [vmem:[#allocation1 + $0x28] sm:$0xff pattern:$0x73625140] }
  0xdb   :  { %546 = vmatmul.f32.vlgmr.msrb.gmra.mxu2 %v419_v42  ;;  %v2875_v42 = vld [vmem:[#allocation55_spill] sm:$0xff] }
  0xdc   :  { %v279_v32 = vadd.f32 %v278_v46, %v259_v61  ;;  %v420_v46 = vld.sshfl [vmem:[#allocation1 + $0x30] sm:$0xff pattern:$0x73625140]  ;;  %768 = vmatpush.msrb.mxu2 %v2856_v43  ;;  %v2868_v61 = vld [vmem:[#allocation85_spill] sm:$0xff]  ;;  %v2907_v43 = vld [vmem:[#allocation56_spill] sm:$0xff] }
  0xdd   :  { %v298_v45 = vpop.f32.mrf.mxu3  ;;  %566 = vmatmul.f32.vlgmr.msrb.gmra.mxu3 %v420_v46  ;;  %v2884_v46 = vld [vmem:[#allocation86_spill] sm:$0xff] }
  0xde   :  { %v299_v34 = vadd.f32 %v298_v45, %v279_v32  ;;  %v418_v32 = vld.sshfl [vmem:[#allocation1 + $0x20] sm:$0xff pattern:$0x73625140] }
  0xdf   :  { %526 = vmatmul.f32.vlgmr.msrb.gmra.mxu1 %v418_v32  ;;  %622 = vst [vmem:[#allocation1 + $0x20] ss:$4 sm:$0xff] %v2842_v23  ;;  %v2860_v45 = vld [vmem:[#allocation37_spill] sm:$0xff]  ;;  %v2890_v32 = vld [vmem:[#allocation94_spill] sm:$0xff] }
  0xe0   :  { %v318_v38 = vpop.f32.mrf.mxu0  ;;  %748 = vmatpush.msrb.mxu1 %v1333_v3  ;;  %v614_v3 = vld [vmem:[%s2522_s2] sm:$0x3]  ;;  %769 = vmatpush.msrb.mxu2 %v2860_v45  ;;  %v2897_v23 = vld [vmem:[#allocation18_spill] sm:$0xff] }
  0xe1   :  { %v319_v1 = vadd.f32 %v318_v38, %v299_v34  ;;  %617 = vperm.xlu0 %1204, %v614_v3   ;;  %v647_v29 = vsub.f32 1.0, %v614_v3  ;;  %v2874_v38 = vld [vmem:[#allocation93_spill] sm:$0xff]  ;;  %v2910_v45 = vld [vmem:[#allocation70_spill] sm:$0xff] }
  0xe2   :  { %v338_v4 = vpop.f32.mrf.mxu1  ;;  %749 = vmatpush.msrb.mxu1 %v1355_v7  ;;  %v2843_v7 = vld [vmem:[#allocation40_spill] sm:$0xff]  ;;  %770 = vmatpush.msrb.mxu2 %v2864_v53  ;;  %v2898_v3 = vld [vmem:[#allocation21_spill] sm:$0xff] }
  0xe3   :  { %v339_v8 = vadd.f32 %v338_v4, %v319_v1  ;;  %v2877_v1 = vld [vmem:[#allocation96_spill] sm:$0xff]  ;;  %v2878_v4 = vld [vmem:[#allocation59_spill] sm:$0xff] }
  0xe4   :  { %v358_v12 = vpop.f32.mrf.mxu2  ;;  %750 = vmatpush.msrb.mxu1 %v1372_v10  ;;  %v2845_v10 = vld [vmem:[#allocation49_spill] sm:$0xff]  ;;  %771 = vmatpush.msrb.mxu2 %v2817_v28  ;;  %v2876_v28 = vld [vmem:[#allocation32_spill] sm:$0xff] }
  0xe5   :  { %v359_v13 = vadd.f32 %v358_v12, %v339_v8  ;;  %v2885_v8 = vld [vmem:[#allocation7_spill] sm:$0xff]  ;;  %v2913_v53 = vld [vmem:[#allocation80_spill] sm:$0xff] }
  0xe6   :  { %v378_v34 = vpop.f32.mrf.mxu3  ;;  %751 = vmatpush.msrb.mxu1 %v1396_v14  ;;  %v2847_v14 = vld [vmem:[#allocation57_spill] sm:$0xff]  ;;  %772 = vmatpush.msrb.mxu2 %v2820_v11  ;;  %v1226_v11 = vld [vmem:[%s2525_s5 + $0x178] sm:$0xff]  ;;  %v2889_v12 = vld [vmem:[#allocation91_spill] sm:$0xff] }
  0xe7   :  { %v379_v15 = vadd.f32 %v378_v34, %v359_v13  ;;  %v2891_v13 = vld [vmem:[#allocation9_spill] sm:$0xff]  ;;  %v2892_v34 = vld [vmem:[#allocation95_spill] sm:$0xff] }
  0xe8   :  { %752 = vmatpush.msrb.mxu1 %v1420_v18  ;;  %v2848_v18 = vld [vmem:[#allocation61_spill] sm:$0xff]  ;;  %773 = vmatpush.msrb.mxu2 %v2823_v58  ;;  %v2879_v58 = vld [vmem:[#allocation63_spill] sm:$0xff] }
  0xe9   :  { %v381_v17 = vmax.f32 %v379_v15, 0.0  ;;  %650 = vperm.xlu0 %1204, %v647_v29   ;;  %v2893_v15 = vld [vmem:[#allocation11_spill] sm:$0xff] }
  0xea   :  { %753 = vmatpush.msrb.mxu1 %v1444_v22  ;;  %v2849_v22 = vld [vmem:[#allocation66_spill] sm:$0xff]  ;;  %774 = vmatpush.msrb.mxu2 %v2826_v16  ;;  %v1227_v16 = vld [vmem:[%s2525_s5 + $0x170] sm:$0xff] }
  0xeb   :  { %1167 = vmatmul.msk.f32.vlgmr.msra.gmra.mxu0 %vm385_vm0, %v381_v17  ;;  %v2894_v17 = vld [vmem:[#allocation97_spill] sm:$0xff]  ;;  %v2901_v29 = vld [vmem:[#allocation31_spill] sm:$0xff] }
  0xec   :  { %570 = vmatpush.msra.mxu0 %v2841_v21  ;;  %754 = vmatpush.msrb.mxu1 %v1468_v26  ;;  %v2854_v26 = vld [vmem:[#allocation28_spill] sm:$0xff]  ;;  %v2896_v21 = vld [vmem:[#allocation15_spill] sm:$0xff] }
  0xed   :  { %722 = vmatpush.msra.mxu3 %v2854_v26  ;;  %775 = vmatpush.msrb.mxu2 %v2828_v24  ;;  %v1228_v24 = vld [vmem:[%s2525_s5 + $0x168] sm:$0xff]  ;;  %v2905_v26 = vld [vmem:[#allocation48_spill] sm:$0xff] }
  0xee   :  { %571 = vmatpush.msra.mxu0 %v2843_v7  ;;  %755 = vmatpush.msrb.mxu1 %v1492_v30  ;;  %v2858_v30 = vld [vmem:[#allocation36_spill] sm:$0xff]  ;;  %v2900_v7 = vld [vmem:[#allocation29_spill] sm:$0xff] }
  0xef   :  { %723 = vmatpush.msra.mxu3 %v2858_v30  ;;  %776 = vmatpush.msrb.mxu2 %v2830_v49  ;;  %v1229_v49 = vld [vmem:[%s2525_s5 + $0x160] sm:$0xff]  ;;  %v2908_v30 = vld [vmem:[#allocation60_spill] sm:$0xff] }
  0xf0   :  { %572 = vmatpush.msra.mxu0 %v2844_v27  ;;  %756 = vmatpush.msrb.mxu1 %v2851_v35  ;;  %v2903_v35 = vld [vmem:[#allocation39_spill] sm:$0xff] }
  0xf1   :  { %788 = vmatpush.msrb.mxu3 %v2862_v50  ;;  %777 = vmatpush.msrb.mxu2 %v1925_v56  ;;  %v2880_v56 = vld [vmem:[#allocation79_spill] sm:$0xff]  ;;  %v2911_v50 = vld [vmem:[#allocation72_spill] sm:$0xff] }
  0xf2   :  { %573 = vmatpush.msra.mxu0 %v2845_v10  ;;  %757 = vmatpush.msrb.mxu1 %v2855_v41  ;;  %v2906_v41 = vld [vmem:[#allocation52_spill] sm:$0xff] }
  0xf3   :  { %506 = vmatmul.f32.vlgmr.msrb.gmra.mxu0 %v417_v5  ;;  %789 = vmatpush.msrb.mxu3 %v2866_v63  ;;  %v2881_v5 = vld [vmem:[#allocation82_spill] sm:$0xff]  ;;  %v2914_v63 = vld [vmem:[#allocation84_spill] sm:$0xff] }
  0xf4   :  { %574 = vmatpush.msra.mxu0 %v2846_v31  ;;  %758 = vmatpush.msrb.mxu1 %v2859_v20  ;;  %v2909_v20 = vld [vmem:[#allocation65_spill] sm:$0xff] }
  0xf5   :  { %790 = vmatpush.msrb.mxu3 %v2869_v57  ;;  %778 = vmatpush.msrb.mxu2 %v2831_v36  ;;  %v2883_v36 = vld [vmem:[#allocation83_spill] sm:$0xff]  ;;  %v2916_v57 = vld [vmem:[#allocation92_spill] sm:$0xff] }
  0xf6   :  { %575 = vmatpush.msra.mxu0 %v2847_v14  ;;  %759 = vmatpush.msrb.mxu1 %v2863_v51  ;;  %v2912_v51 = vld [vmem:[#allocation75_spill] sm:$0xff] }
  0xf7   :  { %791 = vmatpush.msrb.mxu3 %v2872_v2  ;;  %779 = vmatpush.msrb.mxu2 %v2833_v60  ;;  %v2887_v60 = vld [vmem:[#allocation90_spill] sm:$0xff] }
  0xf8   :  { %576 = vmatpush.msra.mxu0 %v2848_v18  ;;  %760 = vmatpush.msrb.mxu1 %v2867_v52  ;;  %v2915_v52 = vld [vmem:[#allocation88_spill] sm:$0xff] }
  0xf9   :  { %792 = vmatpush.msrb.mxu3 %v2875_v42  ;;  %780 = vmatpush.msrb.mxu2 %v2881_v5  ;;  %v628_v5 = vld.sshfl [vmem:[#allocation1 + $0x28] sm:$0xff pattern:$0x73625140] }
  0xfa   :  { %577 = vmatpush.msra.mxu0 %v2849_v22  ;;  %761 = vmatpush.msrb.mxu1 %v2870_v55  ;;  %v2401_v55 = vld [vmem:[%s2528_s8] ss:$0 sm:$0xff] }
  0xfb   :  { %793 = vmatpush.msrb.mxu3 %v2878_v4  ;;  %781 = vmatpush.msrb.mxu2 %v2884_v46  ;;  %v2406_v4 = vld.sshfl [vmem:[#allocation1 + $0x18] sm:$0xff pattern:$0x73625140] }
  0xfc   :  { %578 = vmatpush.msra.mxu0 %v2853_v39  ;;  %762 = vmatpush.msrb.mxu1 %v2873_v48  ;;  %v624_v48 = vld.sshfl [vmem:[#allocation1 + $0x8] sm:$0xff pattern:$0x73625140]  ;;  %v2416_v46 = vld.sshfl [vmem:[#allocation1 + $0x38] sm:$0xff pattern:$0x73625140] }
  0xfd   :  { %794 = vmatpush.msrb.mxu3 %v2879_v58  ;;  %782 = vmatpush.msrb.mxu2 %v2887_v60 }
  0xfe   :  { %579 = vmatpush.msra.mxu0 %v2857_v44  ;;  %763 = vmatpush.msrb.mxu1 %v2876_v28  ;;  %v625_v28 = vld.sshfl [vmem:[#allocation1 + $0x10] sm:$0xff pattern:$0x73625140] }
  0xff   :  { %795 = vmatpush.msrb.mxu3 %v2824_v40  ;;  %v1230_v40 = vld [vmem:[%s2525_s5 + $0x158] sm:$0xff]  ;;  %783 = vmatpush.msrb.mxu2 %v2890_v32 }
 0x100   :  { %580 = vmatpush.msra.mxu0 %v2861_v47 }
 0x101   :  { %796 = vmatpush.msrb.mxu3 %v1930_v62  ;;  %v2882_v62 = vld [vmem:[#allocation6_spill] sm:$0xff] }
 0x102   :  { %581 = vmatpush.msra.mxu0 %v2865_v59 }
 0x103   :  { %797 = vmatpush.msrb.mxu3 %v1955_v54  ;;  %v2886_v54 = vld [vmem:[#allocation87_spill] sm:$0xff] }
 0x104   :  { %582 = vmatpush.msra.mxu0 %v2868_v61 }
 0x105   :  { %798 = vmatpush.msrb.mxu3 %v2880_v56 }
 0x106   :  { %583 = vmatpush.msra.mxu0 %v2871_v0 }
 0x107   :  { %799 = vmatpush.msrb.mxu3 %v2883_v36  ;;  %v629_v36 = vld.sshfl [vmem:[#allocation1 + $0x30] sm:$0xff pattern:$0x73625140] }
 0x108   :  { %584 = vmatpush.msra.mxu0 %v2874_v38 }
 0x109   :  { %800 = vmatpush.msrb.mxu3 %v2886_v54 }
 0x10a   :  { %585 = vmatpush.msra.mxu0 %v2877_v1 }
 0x10b   :  { %586 = vmatmul.f32.vlgmr.msra.gmra.mxu0 %v2271_v19  ;;  %801 = vmatpush.msrb.mxu3 %v2889_v12  ;;  %v2895_v19 = vld [vmem:[#allocation13_spill] sm:$0xff] }
 0x10c   :  { %728 = vmatpush.msrb.mxu0 %v1226_v11 }
 0x10d   :  { %802 = vmatpush.msrb.mxu3 %v2892_v34  ;;  %v2918_v34 = vld [vmem:[#allocation64_spill] sm:$0xff] }
 0x10e   :  { %729 = vmatpush.msrb.mxu0 %v1227_v16 }
 0x10f   :  { %803 = vmatpush.msrb.mxu3 %v2894_v17 }
 0x110   :  { %730 = vmatpush.msrb.mxu0 %v1228_v24  ;;  %v623_v24 = vld.sshfl [vmem:[#allocation1] sm:$0xff pattern:$0x73625140] }
 0x112   :  { %731 = vmatpush.msrb.mxu0 %v1229_v49 }
 0x114   :  { %732 = vmatpush.msrb.mxu0 %v1230_v40  ;;  %v2917_v40 = vld [vmem:[#allocation47_spill] sm:$0xff] }
 0x115   :  { %653 = vst [vmem:[#allocation1] ss:$4 sm:$0xff] %v2917_v40 }
 0x116   :  { %733 = vmatpush.msrb.mxu0 %v2882_v62 }
 0x118   :  { %734 = vmatpush.msrb.mxu0 %v2885_v8 }
 0x11a   :  { %735 = vmatpush.msrb.mxu0 %v2888_v9  ;;  %v627_v9 = vld.sshfl [vmem:[#allocation1 + $0x20] sm:$0xff pattern:$0x73625140] }
 0x11b   :  { %655 = vst [vmem:[#allocation1 + $0x20] ss:$4 sm:$0xff] %v2918_v34 }
 0x11c   :  { %736 = vmatpush.msrb.mxu0 %v2891_v13  ;;  %v656_v60 = vld.sshfl [vmem:[#allocation1] sm:$0xff pattern:$0x73625140]  ;;  %v657_v17 = vld.sshfl [vmem:[#allocation1 + $0x8] sm:$0xff pattern:$0x73625140] }
 0x11d   :  { %v659_v40 = vld.sshfl [vmem:[#allocation1 + $0x18] sm:$0xff pattern:$0x73625140] }
 0x11e   :  { %737 = vmatpush.msrb.mxu0 %v2893_v15 }
 0x120   :  { %738 = vmatpush.msrb.mxu0 %v2895_v19 }
 0x121   :  { %v447_v11 = vpop.f32.mrf.mxu1 }
 0x122   :  { %739 = vmatpush.msrb.mxu0 %v2896_v21  ;;  %v448_v49 = vadd.f32 %v2244_v6, %v447_v11 }
 0x124   :  { %740 = vmatpush.msrb.mxu0 %v2897_v23 }
 0x125   :  { %v487_v8 = vpop.f32.mrf.mxu3 }
 0x126   :  { %741 = vmatpush.msrb.mxu0 %v2898_v3 }
 0x127   :  { %v467_v56 = vpop.f32.mrf.mxu2 }
 0x128   :  { %742 = vmatpush.msrb.mxu0 %v2899_v25  ;;  %v468_v62 = vadd.f32 %v467_v56, %v448_v49 }
 0x12a   :  { %743 = vmatpush.msrb.mxu0 %v2900_v7  ;;  %v488_v12 = vadd.f32 %v487_v8, %v468_v62  ;;  %v1231_v8 = vld [vmem:[%s2525_s5 + $0x3f8] sm:$0xff] }
 0x12c   :  { %808 = vmatpush.msra.mxu0 %v2901_v29  ;;  %v660_v29 = vld.sshfl [vmem:[#allocation1 + $0x20] sm:$0xff pattern:$0x73625140] }
 0x12e   :  { %809 = vmatpush.msra.mxu0 %v2902_v33 }
 0x130   :  { %810 = vmatpush.msra.mxu0 %v2903_v35 }
 0x132   :  { %811 = vmatpush.msra.mxu0 %v2904_v37 }
 0x134   :  { %812 = vmatpush.msra.mxu0 %v2905_v26 }
 0x136   :  { %813 = vmatpush.msra.mxu0 %v2906_v41  ;;  %v658_v41 = vld.sshfl [vmem:[#allocation1 + $0x10] sm:$0xff pattern:$0x73625140] }
 0x138   :  { %814 = vmatpush.msra.mxu0 %v2907_v43  ;;  %v661_v43 = vld.sshfl [vmem:[#allocation1 + $0x28] sm:$0xff pattern:$0x73625140] }
 0x13a   :  { %815 = vmatpush.msra.mxu0 %v2908_v30 }
 0x13c   :  { %816 = vmatpush.msra.mxu0 %v2909_v20 }
 0x13e   :  { %817 = vmatpush.msra.mxu0 %v2910_v45 }
 0x140   :  { %818 = vmatpush.msra.mxu0 %v2911_v50 }
 0x142   :  { %819 = vmatpush.msra.mxu0 %v2912_v51 }
 0x144   :  { %820 = vmatpush.msra.mxu0 %v2913_v53 }
 0x146   :  { %821 = vmatpush.msra.mxu0 %v2914_v63 }
 0x148   :  { %822 = vmatpush.msra.mxu0 %v2915_v52 }
 0x14a   :  { %823 = vmatpush.msra.mxu0 %v2916_v57 }
 0x153   :  { %v2412_v16 = vpop.permute.xlu0 %617 }
 0x154   :  { %v639_v32 = vmul.f32 %v623_v24, %v2412_v16  ;;  %v640_v21 = vmul.f32 %v624_v48, %v2412_v16  ;;  %v643_v35 = vmul.f32 %v627_v9, %v2412_v16  ;;  %v641_v20 = vmul.f32 %v625_v28, %v2412_v16  ;;  %v662_v48 = vld.sshfl [vmem:[#allocation1 + $0x30] sm:$0xff pattern:$0x73625140] }
 0x155   :  { %v644_v50 = vmul.f32 %v628_v5, %v2412_v16  ;;  %v645_v11 = vmul.f32 %v629_v36, %v2412_v16  ;;  %v642_v5 = vmul.f32 %v2406_v4, %v2412_v16  ;;  %v1232_v36 = vld [vmem:[%s2525_s5 + $0x3f0] sm:$0xff]  ;;  %v663_v4 = vld.sshfl [vmem:[#allocation1 + $0x38] sm:$0xff pattern:$0x73625140] }
 0x15b   :  { %v2418_v54 = vpop.permute.xlu0 %650 }
 0x15c   :  { %v672_v13 = vmul.f32 %v656_v60, %v2418_v54  ;;  %v673_v23 = vmul.f32 %v657_v17, %v2418_v54  ;;  %v527_v7 = vpop.f32.mrf.mxu1  ;;  %v676_v37 = vmul.f32 %v660_v29, %v2418_v54  ;;  %v674_v45 = vmul.f32 %v658_v41, %v2418_v54 }
 0x15d   :  { %v677_v51 = vmul.f32 %v661_v43, %v2418_v54  ;;  %v675_v62 = vmul.f32 %v659_v40, %v2418_v54  ;;  %v1250_v29 = vmov 0.0  }
 0x15e   :  { %v680_v19 = vadd.f32 %v672_v13, %v639_v32  ;;  %v681_v25 = vadd.f32 %v673_v23, %v640_v21  ;;  %v547_v26 = vpop.f32.mrf.mxu2  ;;  %v684_v30 = vadd.f32 %v676_v37, %v643_v35  ;;  %v682_v63 = vadd.f32 %v674_v45, %v641_v20  ;;  %v914_v45 = vld [vmem:[%s2523_s3] sm:$0x3]  ;;  %s1251_s3 = smov 123  }
 0x15f   :  { %v685_v57 = vadd.f32 %v677_v51, %v644_v50  ;;  %v683_v60 = vadd.f32 %v675_v62, %v642_v5 }
 0x160   :  { %704 = vmatmul.f32.vlgmr.msra.gmra.mxu2 %v680_v19  ;;  %724 = vmatmul.f32.vlgmr.msra.gmra.mxu3 %v681_v25  ;;  %v567_v52 = vpop.f32.mrf.mxu3 }
 0x161   :  { %744 = vmatmul.f32.vlgmr.msrb.gmra.mxu0 %v682_v63 }
 0x168   :  { %v406_v2 = vpop.f32.mrf.mxu0  ;;  %784 = vmatmul.f32.vlgmr.msrb.gmra.mxu2 %v684_v30  ;;  %804 = vmatmul.f32.vlgmr.msrb.gmra.mxu3 %v685_v57 }
 0x169   :  { %v2404_v42 = vadd.f32 %v2401_v55, %v406_v2 }
 0x16b   :  { %1006 = vrot.lane.b32.xlu0 %v2404_v42, %s1248_s28  ;;  %v988_v58 = vsel %vm987_vm1, %v2404_v42, -inf }
 0x16c   :  { %989 = vmax.xlane.f32.xlu1 %v988_v58  ;;  %v678_v58 = vmul.f32 %v662_v48, %v2418_v54  ;;  %v917_v48 = vsub.f32 0.0, %v2404_v42 }
 0x16e   :  { %v686_v49 = vadd.f32 %v678_v58, %v645_v11  ;;  %v918_v58 = vmul.f32 1.442695, %v917_v48 }
 0x170   :  { %v507_v15 = vpop.f32.mrf.mxu0  ;;  %824 = vmatmul.f32.vlgmr.msra.gmra.mxu0 %v686_v49 }
 0x171   :  { %v508_v3 = vadd.f32 %v507_v15, %v488_v12 }
 0x173   :  { %v528_v33 = vadd.f32 %v527_v7, %v508_v3  ;;  %v1207_v7 = vld [vmem:[%s2529_s9] ss:$0 sm:$0xff] }
 0x175   :  { %v548_v53 = vadd.f32 %v547_v26, %v528_v33 }
 0x177   :  { %v568_v2 = vadd.f32 %v567_v52, %v548_v53 }
 0x188   :  { %v587_v28 = vpop.f32.mrf.mxu0 }
 0x189   :  { %v588_v24 = vadd.f32 %v587_v28, %v568_v2 }
 0x18b   :  { %v590_v56 = vmax.f32 %v588_v24, 0.0 }
 0x18d   :  { %1168 = vmatmul.msk.f32.vlgmr.msra.gmra.mxu1 %vm385_vm0, %v590_v56 }
 0x18e   :  { %828 = vmatpush.msra.mxu1 %v1231_v8 }
 0x190   :  { %829 = vmatpush.msra.mxu1 %v1232_v36 }
 0x192   :  { %830 = vmatpush.msra.mxu1 %v2844_v27  ;;  %v646_v27 = vmul.f32 %v2416_v46, %v2412_v16  ;;  %v857_v16 = vld [vmem:[%s2530_s10 + $0x8] sm:$0xff] }
 0x194   :  { %831 = vmatpush.msra.mxu1 %v2845_v10  ;;  %v679_v10 = vmul.f32 %v663_v4, %v2418_v54 }
 0x195   :  { %764 = vmatmul.f32.vlgmr.msrb.gmra.mxu1 %v683_v60 }
 0x196   :  { %832 = vmatpush.msra.mxu1 %v2846_v31  ;;  %v687_v31 = vadd.f32 %v679_v10, %v646_v27 }
 0x198   :  { %833 = vmatpush.msra.mxu1 %v2847_v14 }
 0x19a   :  { %834 = vmatpush.msra.mxu1 %v2848_v18 }
 0x19c   :  { %835 = vmatpush.msra.mxu1 %v2849_v22 }
 0x19e   :  { %836 = vmatpush.msra.mxu1 %v2853_v39 }
 0x1a0   :  { %837 = vmatpush.msra.mxu1 %v2857_v44  ;;  %v915_v44 = vld [vmem:[%s2524_s4] sm:$0x3] }
 0x1a2   :  { %838 = vmatpush.msra.mxu1 %v2861_v47  ;;  %v859_v47 = vld [vmem:[%s2530_s10 + $0x18] sm:$0xff] }
 0x1a3   :  { %875 = vmatpush.msra.mxu2 %v859_v47 }
 0x1a4   :  { %839 = vmatpush.msra.mxu1 %v2865_v59 }
 0x1a6   :  { %840 = vmatpush.msra.mxu1 %v2868_v61 }
 0x1a8   :  { %841 = vmatpush.msra.mxu1 %v2871_v0  ;;  %v858_v0 = vld [vmem:[%s2530_s10 + $0x10] sm:$0xff] }
 0x1a9   :  { %876 = vmatpush.msra.mxu2 %v858_v0 }
 0x1aa   :  { %842 = vmatpush.msra.mxu1 %v2874_v38 }
 0x1ab   :  { %877 = vmatpush.msra.mxu2 %v857_v16 }
 0x1ac   :  { %843 = vmatpush.msra.mxu1 %v2877_v1 }
 0x1ad   :  { %844 = vmatmul.f32.vlgmr.msra.gmra.mxu1 %v687_v31 }
 0x1dd   :  { %v1007_v50 = vpop.permute.xlu0 %1006 }
 0x1de   :  { %v745_v12 = vpop.f32.mrf.mxu0  ;;  %v1009_v51 = vmul.f32 %v1007_v50, %v914_v45 }
 0x1df   :  { %v2460_v14 = vpop.xlane.xlu1 %989 }
 0x1e0   :  { %v991_v18 = vsub.f32 %v2404_v42, %v2460_v14  ;;  %v1010_v52 = vsel %vm998_vm3, %v1009_v51, 0.0 }
 0x1e2   :  { %v992_v22 = vmul.f32 1.442695, %v991_v18 }
 0x1e3   :  { %v705_v38 = vpop.f32.mrf.mxu2  ;;  %v725_v54 = vpop.f32.mrf.mxu3 }
 0x1e4   :  { %1208 = vpow2.f32 %v992_v22  ;;  %v706_v46 = vadd.f32 %v2244_v6, %v705_v38 }
 0x1e6   :  { %v726_v9 = vadd.f32 %v725_v54, %v706_v46 }
 0x1e8   :  { %v746_v32 = vadd.f32 %v745_v12, %v726_v9 }
 0x1ea   :  { %v1209_v39 = vpop.eup %1208 }
 0x1eb   :  { %995 = vrot.lane.b32.xlu2 %v1209_v39, %s1248_s28  ;;  %v785_v15 = vpop.f32.mrf.mxu2  ;;  %v805_v19 = vpop.f32.mrf.mxu3 }
 0x1ed   :  { %v825_v23 = vpop.f32.mrf.mxu0 }
 0x1f3   :  { %1068 = vrot.lane.b32.xlu2 %v915_v44, %s1249_s13 }
 0x20a   :  { %v611_v59 = vpop.f32.mrf.mxu1 }
 0x20b   :  { %v2472_v61 = vadd.f32 %v2401_v55, %v611_v59  ;;  %v856_v55 = vld [vmem:[%s2530_s10] sm:$0xff] }
 0x20c   :  { %878 = vmatpush.msra.mxu2 %v856_v55 }
 0x20d   :  { %v1028_v1 = vsel %vm987_vm1, %v2472_v61, -inf  ;;  %v950_v56 = vsub.f32 0.0, %v2472_v61 }
 0x20e   :  { %1029 = vmax.xlane.f32.xlu1 %v1028_v1 }
 0x20f   :  { %v951_v8 = vmul.f32 1.442695, %v950_v56 }
 0x212   :  { %v765_v13 = vpop.f32.mrf.mxu1 }
 0x213   :  { %v766_v34 = vadd.f32 %v765_v13, %v746_v32 }
 0x215   :  { %v786_v17 = vadd.f32 %v785_v15, %v766_v34 }
 0x217   :  { %v806_v21 = vadd.f32 %v805_v19, %v786_v17 }
 0x219   :  { %v826_v3 = vadd.f32 %v825_v23, %v806_v21 }
 0x227   :  { %1045 = vrot.lane.b32.xlu1 %v2472_v61, %s1248_s28 }
 0x22a   :  { %v845_v6 = vpop.f32.mrf.mxu1 }
 0x22b   :  { %v846_v25 = vadd.f32 %v845_v6, %v826_v3 }
 0x22d   :  { %vm848_vm2 = vcmp.gt.f32.partialorder %v846_v25, 0.0 }
 0x22e   :  { %v1169_v33 = vsel %vm848_vm2, 1.0, %v1250_v29 }
 0x22f   :  { %v855_v35 = vmul.f32 %v1207_v7, %v1169_v33 }
 0x231   :  { %1170 = vmatmul.msk.f32.vlgmr.msra.gmra.mxu2 %vm385_vm0, %v855_v35 }
 0x245   :  { %v996_v37 = vpop.permute.xlu2 %995 }
 0x246   :  { %v999_v26 = vsel %vm998_vm3, %v996_v37, 0.0 }
 0x247   :  { %1000 = vadd.xlane.f32.xlu2 %v999_v26 }
 0x24d   :  { %v1069_v24 = vpop.permute.xlu2 %1068 }
 0x24e   :  { %v1071_v49 = vsub.f32 %v2404_v42, %v1069_v24  ;;  %v1092_v36 = vsub.f32 %v2472_v61, %v1069_v24 }
 0x250   :  { %v1072_v62 = vmul.f32 %v1071_v49, %v1071_v49  ;;  %v1093_v60 = vmul.f32 %v1092_v36, %v1092_v36 }
 0x281   :  { %v2493_v41 = vpop.xlane.xlu1 %1029 }
 0x282   :  { %v1031_v43 = vsub.f32 %v2472_v61, %v2493_v41 }
 0x284   :  { %v1032_v30 = vmul.f32 1.442695, %v1031_v43 }
 0x286   :  { %1210 = vpow2.f32 %v1032_v30 }
 0x287   :  { %1212 = vpow2.f32 %v918_v58 }
 0x28c   :  { %v1211_v20 = vpop.eup %1210 }
 0x28d   :  { %1035 = vrot.lane.b32.xlu2 %v1211_v20, %s1248_s28  ;;  %v1213_v40 = vpop.eup %1212 }
 0x28e   :  { %v920_v5 = vadd.f32 1.0, %v1213_v40 }
 0x290   :  { %1214 = vrcp.f32 %v920_v5  ;;  %v932_v59 = vand.u32 2147483648, %v920_v5  ;;  %vm926_vm6 = vweird.f32 %v920_v5  ;;  %v930_v38 = vand.u32 2147483647, %v920_v5 }
 0x291   :  { %1216 = vpow2.f32 %v951_v8 }
 0x292   :  { %v933_v16 = vor.u32 1.1754944e-38, %v932_v59  ;;  %vm931_vm8 = vcmp.eq.f32.partialorder %v930_v38, 8.507059e+37 }
 0x296   :  { %v1215_v4 = vpop.eup %1214 }
 0x297   :  { %v1217_v27 = vpop.eup %1216  ;;  %v922_v31 = vmul.f32 %v1215_v4, %v920_v5  ;;  %vm927_vm5 = vweird.f32 %v1215_v4 }
 0x298   :  { %v953_v10 = vadd.f32 1.0, %v1217_v27  ;;  %vm928_vm7 = vmor %vm926_vm6, %vm927_vm5 }
 0x299   :  { %v1046_v2 = vpop.permute.xlu1 %1045  ;;  %v923_v42 = vsub.f32 1.0, %v922_v31 }
 0x29a   :  { %v1048_v11 = vmul.f32 %v1046_v2, %v914_v45  ;;  %1218 = vrcp.f32 %v953_v10  ;;  %v965_v32 = vand.u32 2147483648, %v953_v10  ;;  %vm959_vm11 = vweird.f32 %v953_v10 }
 0x29b   :  { %v924_v22 = vmul.f32 %v1215_v4, %v923_v42  ;;  %v963_v13 = vand.u32 2147483647, %v953_v10 }
 0x29c   :  { %v1049_v28 = vsel %vm998_vm3, %v1048_v11, 0.0  ;;  %v966_v15 = vor.u32 1.1754944e-38, %v965_v32 }
 0x29d   :  { %v925_v44 = vadd.f32 %v1215_v4, %v924_v22  ;;  %vm964_vm13 = vcmp.eq.f32.partialorder %v963_v13, 8.507059e+37 }
 0x29f   :  { %v929_v1 = vsel %vm928_vm7, %v1215_v4, %v925_v44 }
 0x2a0   :  { %v1219_v39 = vpop.eup %1218  ;;  %v934_v55 = vsel %vm931_vm8, %v933_v16, %v929_v1 }
 0x2a1   :  { %v955_v61 = vmul.f32 %v1219_v39, %v953_v10  ;;  %v936_v9 = vsel %vm903_vm9, %v934_v55, 0.0  ;;  %vm960_vm10 = vweird.f32 %v1219_v39 }
 0x2a2   :  { %vm961_vm12 = vmor %vm959_vm11, %vm960_vm10 }
 0x2a3   :  { %v956_v46 = vsub.f32 1.0, %v955_v61 }
 0x2a5   :  { %v957_v54 = vmul.f32 %v1219_v39, %v956_v46 }
 0x2a7   :  { %v958_v12 = vadd.f32 %v1219_v39, %v957_v54 }
 0x2a9   :  { %v962_v34 = vsel %vm961_vm12, %v1219_v39, %v958_v12 }
 0x2aa   :  { %v967_v17 = vsel %vm964_vm13, %v966_v15, %v962_v34 }
 0x2ab   :  { %v969_v19 = vsel %vm903_vm9, %v967_v17, 0.0 }
 0x2b4   :  { %v880_v53 = vpop.f32.mrf.mxu2 }
 0x2b5   :  { %v883_v63 = vmul.f32 %v880_v53, %v855_v35 }
 0x2b6   :  { %1011 = vadd.xlane.f32.xlu2 %v1010_v52 }
 0x2b7   :  { %v885_v57 = vsel %vm884_vm4, %v883_v63, 0.0 }
 0x2b8   :  { %886 = vadd.xlane.f32.xlu0 %v885_v57 }
 0x2ba   :  { %v1001_v18 = vpop.xlane.xlu2 %1000 }
 0x2bb   :  { %1220 = vlog2.f32 %v1001_v18 }
 0x2c0   :  { %1050 = vadd.xlane.f32.xlu0 %v1049_v28 }
 0x2c1   :  { %v1221_v21 = vpop.eup %1220 }
 0x2c2   :  { %v1003_v23 = vmul.f32 0.6931472, %v1221_v21 }
 0x2c4   :  { %v1004_v3 = vadd.f32 %v1003_v23, %v2460_v14 }
 0x2ce   :  { %1074 = vrot.lane.b32.xlu2 %v1072_v62, %s1251_s3 }
 0x2d4   :  { %1095 = vrot.lane.b32.xlu0 %v1093_v60, %s1251_s3 }
 0x2e7   :  { %v1036_v47 = vpop.permute.xlu2 %1035 }
 0x2e8   :  { %v1038_v0 = vsel %vm998_vm3, %v1036_v47, 0.0 }
 0x2e9   :  { %1039 = vadd.xlane.f32.xlu1 %v1038_v0 }
 0x2f1   :  { %937 = vadd.xlane.f32.xlu1 %v936_v9 }
 0x2fe   :  { %970 = vadd.xlane.f32.xlu0 %v969_v19 }
 0x329   :  { %v1012_v6 = vpop.xlane.xlu2 %1011 }
 0x32a   :  { %v1013_v25 = vsub.f32 %v1004_v3, %v1012_v6 }
 0x32b   :  { %v887_v7 = vpop.xlane.xlu0 %886 }
 0x32c   :  { %v888_v29 = vmax.f32 %v887_v7, 0.0  ;;  %v1014_v33 = vsel %vm903_vm9, %v1013_v25, 0.0 }
 0x32d   :  { %1015 = vadd.xlane.f32.xlu2 %v1014_v33 }
 0x32e   :  { %1222 = vrsqrt.f32 %v888_v29  ;;  %vm896_vm15 = vcmp.eq.f32.partialorder %v888_v29, inf  ;;  %v899_v51 = vand.u32 2147483648, %v888_v29  ;;  %vm898_vm0 = vcmp.eq.f32.partialorder %v888_v29, 0.0 }
 0x331   :  { %v1075_v35 = vpop.permute.xlu2 %1074 }
 0x332   :  { %v1078_v37 = vsel %vm1077_vm14, %v1075_v35, 0.0 }
 0x333   :  { %1079 = vadd.xlane.f32.xlu1 %v1078_v37  ;;  %v1051_v24 = vpop.xlane.xlu0 %1050 }
 0x334   :  { %v1223_v26 = vpop.eup %1222 }
 0x335   :  { %v890_v43 = vmul.f32 %v1223_v26, %v888_v29 }
 0x337   :  { %v891_v30 = vmul.f32 %v1223_v26, %v890_v43 }
 0x339   :  { %v892_v20 = vmul.f32 0.5, %v891_v30 }
 0x33b   :  { %v893_v45 = vsub.f32 1.5, %v892_v20 }
 0x33d   :  { %v894_v50 = vmul.f32 %v1223_v26, %v893_v45 }
 0x33f   :  { %v895_v14 = vmul.f32 %v894_v50, %v888_v29 }
 0x341   :  { %v897_v53 = vsel %vm896_vm15, %v888_v29, %v895_v14 }
 0x342   :  { %v900_v63 = vsel %vm898_vm0, %v899_v51, %v897_v53 }
 0x343   :  { %v1171_v52 = vadd.f32 -1.0, %v900_v63 }
 0x345   :  { %v902_v57 = vmul.f32 %v1171_v52, %v1171_v52 }
 0x346   :  { %v1096_v56 = vpop.permute.xlu0 %1095 }
 0x347   :  { %v904_v2 = vsel %vm903_vm9, %v902_v57, 0.0  ;;  %v1098_v5 = vsel %vm1077_vm14, %v1096_v56, 0.0 }
 0x348   :  { %905 = vadd.xlane.f32.xlu1 %v904_v2 }
 0x35c   :  { %v1040_v48 = vpop.xlane.xlu1 %1039 }
 0x35d   :  { %1224 = vlog2.f32 %v1040_v48 }
 0x363   :  { %v1225_v11 = vpop.eup %1224 }
 0x364   :  { %v1042_v58 = vmul.f32 0.6931472, %v1225_v11  ;;  %v938_v62 = vpop.xlane.xlu1 %937 }
 0x365   :  { %v939_v60 = vrot.slane %v938_v62, 4 }
 0x366   :  { %v1043_v28 = vadd.f32 %v1042_v58, %v2493_v41 }
 0x367   :  { %v940_v31 = vadd.f32 %v939_v60, %v938_v62 }
 0x368   :  { %v1052_v49 = vsub.f32 %v1043_v28, %v1051_v24 }
 0x369   :  { %v941_v41 = vrot.slane %v940_v31, 2 }
 0x36a   :  { %v1053_v40 = vsel %vm903_vm9, %v1052_v49, 0.0 }
 0x36b   :  { %1054 = vadd.xlane.f32.xlu1 %v1053_v40  ;;  %v942_v61 = vadd.f32 %v941_v41, %v940_v31 }
 0x36d   :  { %v943_v46 = vrot.slane %v942_v61, 1 }
 0x36f   :  { %v944_v32 = vadd.f32 %v943_v46, %v942_v61 }
 0x371   :  { %v971_v8 = vpop.xlane.xlu0 %970 }
 0x372   :  { %v972_v27 = vrot.slane %v971_v8, 4 }
 0x373   :  { %1099 = vadd.xlane.f32.xlu1 %v1098_v5 }
 0x374   :  { %v973_v42 = vadd.f32 %v972_v27, %v971_v8 }
 0x376   :  { %v974_v39 = vrot.slane %v973_v42, 2 }
 0x378   :  { %v975_v0 = vadd.f32 %v974_v39, %v973_v42 }
 0x37a   :  { %v976_v54 = vrot.slane %v975_v0, 1 }
 0x37c   :  { %v977_v13 = vadd.f32 %v976_v54, %v975_v0 }
 0x3a0   :  { %v1016_v36 = vpop.xlane.xlu2 %1015 }
 0x3a1   :  { %v1017_v10 = vrot.slane %v1016_v36, 4 }
 0x3a3   :  { %v1018_v18 = vadd.f32 %v1017_v10, %v1016_v36 }
 0x3a5   :  { %v1019_v47 = vrot.slane %v1018_v18, 2 }
 0x3a6   :  { %v1080_v4 = vpop.xlane.xlu1 %1079 }
 0x3a7   :  { %v1020_v1 = vadd.f32 %v1019_v47, %v1018_v18  ;;  %v1081_v15 = vrot.slane %v1080_v4, 4 }
 0x3a9   :  { %v1021_v9 = vrot.slane %v1020_v1, 1  ;;  %v1082_v17 = vadd.f32 %v1081_v15, %v1080_v4 }
 0x3ab   :  { %v1022_v34 = vadd.f32 %v1021_v9, %v1020_v1  ;;  %v1083_v19 = vrot.slane %v1082_v17, 2 }
 0x3ad   :  { %v1084_v6 = vadd.f32 %v1083_v19, %v1082_v17 }
 0x3af   :  { %v1085_v33 = vrot.slane %v1084_v6, 1 }
 0x3b1   :  { %v1086_v30 = vadd.f32 %v1085_v33, %v1084_v6 }
 0x3bb   :  { %v906_v22 = vpop.xlane.xlu1 %905 }
 0x3bc   :  { %v907_v44 = vrot.slane %v906_v22, 4 }
 0x3be   :  { %v908_v59 = vadd.f32 %v907_v44, %v906_v22 }
 0x3c0   :  { %v909_v38 = vrot.slane %v908_v59, 2 }
 0x3c2   :  { %v910_v16 = vadd.f32 %v909_v38, %v908_v59 }
 0x3c4   :  { %v911_v55 = vrot.slane %v910_v16, 1 }
 0x3c6   :  { %v912_v12 = vadd.f32 %v911_v55, %v910_v16 }
 0x3c8   :  { %1184 = vpush %v912_v12 }
 0x3c9   :  { %1186 = vpush %v944_v32 }
 0x3ca   :  { %1188 = vpush %v977_v13 }
 0x3cb   :  { %1190 = vpush %v1022_v34 }
 0x3de   :  { %v1055_v21 = vpop.xlane.xlu1 %1054 }
 0x3df   :  { %v1056_v23 = vrot.slane %v1055_v21, 4 }
 0x3e1   :  { %v1057_v3 = vadd.f32 %v1056_v23, %v1055_v21 }
 0x3e3   :  { %v1058_v25 = vrot.slane %v1057_v3, 2 }
 0x3e5   :  { %v1059_v7 = vadd.f32 %v1058_v25, %v1057_v3 }
 0x3e6   :  { %v1100_v29 = vpop.xlane.xlu1 %1099 }
 0x3e7   :  { %v1101_v35 = vrot.slane %v1100_v29, 4  ;;  %v1060_v37 = vrot.slane %v1059_v7, 1 }
 0x3e9   :  { %v1102_v26 = vadd.f32 %v1101_v35, %v1100_v29  ;;  %v1061_v43 = vadd.f32 %v1060_v37, %v1059_v7 }
 0x3eb   :  { %v1103_v20 = vrot.slane %v1102_v26, 2  ;;  %1192 = vpush %v1061_v43 }
 0x3ec   :  { %1194 = vpush %v1086_v30 }
 0x3ed   :  { %v1104_v45 = vadd.f32 %v1103_v20, %v1102_v26 }
 0x3ef   :  { %v1105_v50 = vrot.slane %v1104_v45, 1 }
 0x3f1   :  { %v1106_v14 = vadd.f32 %v1105_v50, %v1104_v45 }
 0x3f3   :  { %1196 = vpush %v1106_v14 }
 0x3f9   :  { %s1185_s20 = spop %1184 }
 0x3fa   :  { %s1121_s21 = smul.f32 10.0, %s1185_s20  ;;  %s1187_s22 = spop %1186 }
 0x3fb   :  { %s1115_s23 = smul.f32 0.5, %s1187_s22  ;;  %s1189_s24 = spop %1188 }
 0x3fc   :  { %s1122_s0 = smul.f32 0.5, %s1121_s21  ;;  %s1191_s8 = spop %1190 }
 0x3fd   :  { %s1119_s25 = ssub.f32 0.0, %s1115_s23  ;;  %s1117_s26 = smul.f32 0.5, %s1189_s24 }
 0x3fe   :  { %1137 = sst [smem:[#allocation3 + $0x1]] %s1122_s0  ;;  %s1127_s12 = smul.f32 0.5, %s1191_s8 }
 0x3ff   :  { %1147 = sst [smem:[#allocation3 + $0x5]] %s1119_s25 }
 0x400   :  { %s1118_s27 = ssub.f32 %s1115_s23, %s1117_s26 }
 0x402   :  { %s1133_s28 = sadd.f32 %s1119_s25, %s1118_s27 }
 0x403   :  { %1145 = sst [smem:[#allocation3 + $0x4]] %s1118_s27 }
 0x404   :  { %1135 = sst [smem:[#allocation3]] %s1133_s28 }
 0x41c   :  { %s1193_s29 = spop %1192 }
 0x41d   :  { %s1125_s30 = sadd.f32 %s1193_s29, %s1191_s8  ;;  %s1195_s13 = spop %1194 }
 0x41e   :  { %s1132_s7 = smul.f32 0.25, %s1195_s13 }
 0x41f   :  { %s1126_s5 = smul.f32 0.25, %s1125_s30 }
 0x421   :  { %s1138_s1 = sadd.f32 %s1127_s12, %s1126_s5 }
 0x422   :  { %1149 = sst [smem:[#allocation3 + $0x6]] %s1126_s5 }
 0x423   :  { %1140 = sst [smem:[#allocation3 + $0x2]] %s1138_s1 }
 0x424   :  { %s1197_s14 = spop %1196 }
 0x425   :  { %s1130_s15 = sadd.f32 %s1197_s14, %s1195_s13 }
 0x427   :  { %s1131_s17 = smul.f32 0.125, %s1130_s15 }
 0x429   :  { %s1141_s2 = sadd.f32 %s1132_s7, %s1131_s17 }
 0x42a   :  { %1151 = sst [smem:[#allocation3 + $0x7]] %s1131_s17 }
 0x42b   :  { %1143 = sst [smem:[#allocation3 + $0x3]] %s1141_s2 }
 0x42c   :  { %1160 = dma.smem_to_hbm %s1252_s18, 16, %s1158_s6, [#allocation4]  }
 0x42d   :  { %1245 = dma.done.wait [#allocation4], 16  }
 0x42e   :  { %1246 = vsyncadd [#allocation4], 4294967280 }
 0x42f   :  { %1165 = sfence }
 0x430   :  { %1166 = vsyncpa [#allocation4], 1 }

</bundles_post_ra>
